<compile_context>
chip_gen: v7x
topology: tpu7x:2x2x1
jax: 0.10.0
libtpu: 0.0.40
codegen_flags: <defaults>
</compile_context>

<pallas_src>
import functools

import jax
import jax.numpy as jnp
from jax import lax
from jax.experimental import pallas as pl
from jax.experimental.pallas import tpu as pltpu

EPS = 1e-5  # nn.LayerNorm default eps


def _layernorm(x, g, b):
    # x: (N, D), g/b: (1, D) -- biased variance, matches PyTorch.
    mu = jnp.mean(x, axis=-1, keepdims=True)
    var = jnp.mean(jnp.square(x - mu), axis=-1, keepdims=True)
    return (x - mu) * lax.rsqrt(var + EPS) * g + b


def encoder_kernel(num_heads, matmul_dtype,
                   x_ref, ln1_g_ref, ln1_b_ref,
                   w_qkv_ref, b_qkv_ref, w_o_ref, b_o_ref,
                   ln2_g_ref, ln2_b_ref,
                   w_fc1_ref, b_fc1_ref, w_fc2_ref, b_fc2_ref,
                   out_ref, att_ref,
                   acc_ref):
    x = x_ref[0].astype(jnp.float32)             # (N, D)
    N, D = x.shape
    dh = D // num_heads
    scale = 1.0 / jnp.sqrt(jnp.float32(dh))

    # ---------------- norm_1 ----------------
    z = _layernorm(x, ln1_g_ref[...], ln1_b_ref[...])
    z_mm = z.astype(matmul_dtype)

    # ---------------- multi-headed self-attention ----------------
    # Per-head: q/k/v come from per-head (D, dh) weight blocks (no lane slicing);
    # attention weights are stored immediately; the output projection is applied
    # per head (ctx_h @ w_o[h*dh:(h+1)*dh, :]) and summed into the VMEM scratch,
    # which is mathematically identical to concat-then-project.
    acc_ref[...] = jnp.zeros_like(acc_ref)
    for h in range(num_heads):                   # static unroll; nothing carried in vregs
        q = jnp.dot(z_mm, w_qkv_ref[0, h],
                    preferred_element_type=jnp.float32) + b_qkv_ref[0, h]   # (N, dh)
        k = jnp.dot(z_mm, w_qkv_ref[1, h],
                    preferred_element_type=jnp.float32) + b_qkv_ref[1, h]
        v = jnp.dot(z_mm, w_qkv_ref[2, h],
                    preferred_element_type=jnp.float32) + b_qkv_ref[2, h]
        # q @ k^T without explicit transpose: contract last dims of both.
        s = lax.dot_general(q.astype(matmul_dtype), k.astype(matmul_dtype),
                            dimension_numbers=(((1,), (1,)), ((), ())),
                            preferred_element_type=jnp.float32) * scale     # (N, N)
        s = s - jnp.max(s, axis=-1, keepdims=True)
        e = jnp.exp(s)
        att = e * pl.reciprocal(jnp.sum(e, axis=-1, keepdims=True), approx=True)
        att_ref[0, h] = att                      # write this head's weights now
        ctx = jnp.dot(att.astype(matmul_dtype), v.astype(matmul_dtype),
                      preferred_element_type=jnp.float32)                   # (N, dh)
        acc_ref[...] += jnp.dot(ctx.astype(matmul_dtype), w_o_ref[h],
                                preferred_element_type=jnp.float32)         # (N, D)

    # dropout -> identity (eval mode); first residual
    x1 = x + acc_ref[...] + b_o_ref[...]

    # ---------------- norm_2 + MLP ----------------
    z2 = _layernorm(x1, ln2_g_ref[...], ln2_b_ref[...])
    h1 = jnp.dot(z2.astype(matmul_dtype), w_fc1_ref[...],
                 preferred_element_type=jnp.float32) + b_fc1_ref[...]
    # exact GELU (PyTorch nn.GELU default, approximate='none')
    h1 = 0.5 * h1 * (1.0 + lax.erf(h1 * (1.0 / jnp.sqrt(jnp.float32(2.0)))))
    h2 = jnp.dot(h1.astype(matmul_dtype), w_fc2_ref[...],
                 preferred_element_type=jnp.float32) + b_fc2_ref[...]

    out_ref[0] = (x1 + h2).astype(out_ref.dtype)  # second residual


def transformer_encoder(x, params, num_heads, matmul_dtype=jnp.bfloat16):
    B, N, D = x.shape
    HID = params["w_fc1"].shape[1]
    assert D % num_heads == 0
    dh = D // num_heads
    f32 = jnp.float32

    # Pre-split QKV / output-projection weights per head in the wrapper so the
    # kernel never slices lanes at non-128 boundaries. Weights go to bf16
    # (matmul_dtype); biases / LN params stay f32.
    w_qkv_h = (params["w_qkv"].reshape(D, 3, num_heads, dh)
               .transpose(1, 2, 0, 3).astype(matmul_dtype))        # (3, H, D, dh)
    b_qkv_h = params["b_qkv"].reshape(3, num_heads, 1, dh).astype(f32)  # (3, H, 1, dh)
    w_o_h = params["w_o"].reshape(num_heads, dh, D).astype(matmul_dtype)  # (H, dh, D)

    args = (
        x,
        params["ln1_g"].astype(f32), params["ln1_b"].astype(f32),
        w_qkv_h, b_qkv_h, w_o_h, params["b_o"].astype(f32),
        params["ln2_g"].astype(f32), params["ln2_b"].astype(f32),
        params["w_fc1"].astype(matmul_dtype), params["b_fc1"].astype(f32),
        params["w_fc2"].astype(matmul_dtype), params["b_fc2"].astype(f32),
    )

    def full(a):
        shape = a.shape
        return pl.BlockSpec(shape, lambda b, _nd=len(shape): (0,) * _nd)

    in_specs = ([pl.BlockSpec((1, N, D), lambda b: (b, 0, 0))]     # x: per-batch block
                + [full(a) for a in args[1:]])                     # weights: full-resident
    out_specs = (
        pl.BlockSpec((1, N, D), lambda b: (b, 0, 0)),
        pl.BlockSpec((1, num_heads, N, N), lambda b: (b, 0, 0, 0)),
    )
    out_shape = (
        jax.ShapeDtypeStruct((B, N, D), x.dtype),
        jax.ShapeDtypeStruct((B, num_heads, N, N), jnp.float32),
    )

    # Explicit VMEM budget: double-buffered weights + x/out/att blocks + scratch.
    weight_bytes = sum(int(a.size) * a.dtype.itemsize for a in args[1:])
    block_bytes = (2 * N * D * x.dtype.itemsize           # x block + out block
                   + num_heads * N * N * 4)                # att block (f32)
    scratch_bytes = N * D * 4
    est = 2 * (weight_bytes + block_bytes) + scratch_bytes + (2 << 20)
    vmem_limit = int(min(64 << 20, max(32 << 20, est)))

    return pl.pallas_call(
        functools.partial(encoder_kernel, num_heads, matmul_dtype),
        grid=(B,),
        in_specs=in_specs,
        out_specs=out_specs,
        out_shape=out_shape,
        scratch_shapes=[pltpu.VMEM((N, D), jnp.float32)],   # attention-output accumulator
        compiler_params=pltpu.CompilerParams(
            dimension_semantics=("parallel",),
            vmem_limit_bytes=vmem_limit),
    )(*args)


def _reference(x, p, num_heads):
    """Pure-JAX f32 reference of the same forward pass (for a sanity check)."""
    B, N, D = x.shape
    dh = D // num_heads

    def ln(v, g, b):
        mu = jnp.mean(v, -1, keepdims=True)
        var = jnp.mean((v - mu) ** 2, -1, keepdims=True)
        return (v - mu) * lax.rsqrt(var + EPS) * g + b

    z = ln(x, p["ln1_g"], p["ln1_b"])
    qkv = z @ p["w_qkv"] + p["b_qkv"]                      # (B, N, 3D)
    q, k, v = jnp.split(qkv, 3, axis=-1)
    split_heads = lambda t: t.reshape(B, N, num_heads, dh).transpose(0, 2, 1, 3)
    q, k, v = split_heads(q), split_heads(k), split_heads(v)
    s = jnp.einsum("bhnd,bhmd->bhnm", q, k) / jnp.sqrt(jnp.float32(dh))
    att = jax.nn.softmax(s, axis=-1)
    o = jnp.einsum("bhnm,bhmd->bhnd", att, v).transpose(0, 2, 1, 3).reshape(B, N, D)
    z = o @ p["w_o"] + p["b_o"]
    x1 = x + z
    z = ln(x1, p["ln2_g"], p["ln2_b"])
    h1 = z @ p["w_fc1"] + p["b_fc1"]
    h1 = 0.5 * h1 * (1.0 + lax.erf(h1 / jnp.sqrt(2.0)))
    h2 = h1 @ p["w_fc2"] + p["b_fc2"]
    return x1 + h2, att


if __name__ == "__main__":
    B, N, D, HID, NH = 2, 8, 32, 64, 4   # batch, seq, embedding_dim, hidden_dim, heads

    key = jax.random.PRNGKey(0)
    ks = jax.random.split(key, 10)

    def init(k, shape, scale=0.05):
        return (scale * jax.random.normal(k, shape)).astype(jnp.float32)

    x = jax.random.normal(ks[0], (B, N, D), jnp.float32)
    params = dict(
        ln1_g=jnp.ones((1, D), jnp.float32), ln1_b=jnp.zeros((1, D), jnp.float32),
        w_qkv=init(ks[1], (D, 3 * D)), b_qkv=init(ks[2], (1, 3 * D), 0.01),
        w_o=init(ks[3], (D, D)), b_o=init(ks[4], (1, D), 0.01),
        ln2_g=jnp.ones((1, D), jnp.float32), ln2_b=jnp.zeros((1, D), jnp.float32),
        w_fc1=init(ks[5], (D, HID)), b_fc1=init(ks[6], (1, HID), 0.01),
        w_fc2=init(ks[7], (HID, D)), b_fc2=init(ks[8], (1, D), 0.01),
    )

    out, att = jax.block_until_ready(transformer_encoder(x, params, NH))

    # sanity check against a pure-JAX f32 reference (bf16 MXU inputs -> loose tol)
    ref_out, ref_att = _reference(x, params, NH)
    assert jnp.allclose(out, ref_out, atol=3e-2, rtol=0), "output mismatch"
    assert jnp.allclose(att, ref_att, atol=2e-2, rtol=0), "attention mismatch"

    print("KERNEL_OK")
</pallas_src>

<mosaic_0001>
module attributes {stable_mosaic.version = 11 : i64} {
  func.func @encoder_kernel(%arg0: i32, %arg1: memref<1x8x32xf32, #tpu.memory_space<vmem>>, %arg2: memref<1x32xf32, #tpu.memory_space<vmem>>, %arg3: memref<1x32xf32, #tpu.memory_space<vmem>>, %arg4: memref<3x4x32x8xbf16, #tpu.memory_space<vmem>>, %arg5: memref<3x4x1x8xf32, #tpu.memory_space<vmem>>, %arg6: memref<4x8x32xbf16, #tpu.memory_space<vmem>>, %arg7: memref<1x32xf32, #tpu.memory_space<vmem>>, %arg8: memref<1x32xf32, #tpu.memory_space<vmem>>, %arg9: memref<1x32xf32, #tpu.memory_space<vmem>>, %arg10: memref<32x64xbf16, #tpu.memory_space<vmem>>, %arg11: memref<1x64xf32, #tpu.memory_space<vmem>>, %arg12: memref<64x32xbf16, #tpu.memory_space<vmem>>, %arg13: memref<1x32xf32, #tpu.memory_space<vmem>>, %arg14: memref<1x8x32xf32, #tpu.memory_space<vmem>>, %arg15: memref<1x4x8x8xf32, #tpu.memory_space<vmem>>, %arg16: memref<8x32xf32, #tpu.memory_space<vmem>>) attributes {dimension_semantics = [#tpu.dimension_semantics<parallel>], iteration_bounds = array<i64: 2>, scalar_prefetch = 0 : i64, scratch_operands = 1 : i64, tpu.core_type = #tpu.core_type<tc>, window_params = [{transform_indices = @transform_0, window_bounds = array<i64: 1, 8, 32>}, {pipeline_mode = #tpu.pipeline_mode<synchronous>, transform_indices = @transform_1, window_bounds = array<i64: 1, 32>}, {pipeline_mode = #tpu.pipeline_mode<synchronous>, transform_indices = @transform_2, window_bounds = array<i64: 1, 32>}, {pipeline_mode = #tpu.pipeline_mode<synchronous>, transform_indices = @transform_3, window_bounds = array<i64: 3, 4, 32, 8>}, {pipeline_mode = #tpu.pipeline_mode<synchronous>, transform_indices = @transform_4, window_bounds = array<i64: 3, 4, 1, 8>}, {pipeline_mode = #tpu.pipeline_mode<synchronous>, transform_indices = @transform_5, window_bounds = array<i64: 4, 8, 32>}, {pipeline_mode = #tpu.pipeline_mode<synchronous>, transform_indices = @transform_6, window_bounds = array<i64: 1, 32>}, {pipeline_mode = #tpu.pipeline_mode<synchronous>, transform_indices = @transform_7, window_bounds = array<i64: 1, 32>}, {pipeline_mode = #tpu.pipeline_mode<synchronous>, transform_indices = @transform_8, window_bounds = array<i64: 1, 32>}, {pipeline_mode = #tpu.pipeline_mode<synchronous>, transform_indices = @transform_9, window_bounds = array<i64: 32, 64>}, {pipeline_mode = #tpu.pipeline_mode<synchronous>, transform_indices = @transform_10, window_bounds = array<i64: 1, 64>}, {pipeline_mode = #tpu.pipeline_mode<synchronous>, transform_indices = @transform_11, window_bounds = array<i64: 64, 32>}, {pipeline_mode = #tpu.pipeline_mode<synchronous>, transform_indices = @transform_12, window_bounds = array<i64: 1, 32>}, {transform_indices = @transform_13, window_bounds = array<i64: 1, 8, 32>}, {transform_indices = @transform_14, window_bounds = array<i64: 1, 4, 8, 8>}]} {
    %c0 = arith.constant 0 : index
    %c0_0 = arith.constant 0 : index
    %c0_1 = arith.constant 0 : index
    %0 = vector.load %arg1[%c0, %c0_0, %c0_1] : memref<1x8x32xf32, #tpu.memory_space<vmem>>, vector<1x8x32xf32>
    %1 = vector.shape_cast %0 : vector<1x8x32xf32> to vector<8x32xf32>
    %cst = arith.constant 8.000000e+00 : f32
    %2 = math.sqrt %cst : f32
    %cst_2 = arith.constant 1.000000e+00 : f32
    %3 = arith.divf %cst_2, %2 : f32
    %c0_3 = arith.constant 0 : index
    %c0_4 = arith.constant 0 : index
    %4 = vector.load %arg2[%c0_3, %c0_4] : memref<1x32xf32, #tpu.memory_space<vmem>>, vector<1x32xf32>
    %c0_5 = arith.constant 0 : index
    %c0_6 = arith.constant 0 : index
    %5 = vector.load %arg3[%c0_5, %c0_6] : memref<1x32xf32, #tpu.memory_space<vmem>>, vector<1x32xf32>
    %cst_7 = arith.constant dense<0.000000e+00> : vector<8xf32>
    %6 = vector.multi_reduction <add>, %1, %cst_7 [1] : vector<8x32xf32> to vector<8xf32>
    %7 = vector.shape_cast %6 : vector<8xf32> to vector<8x1xf32>
    %cst_8 = arith.constant 3.200000e+01 : f32
    %8 = vector.broadcast %cst_8 : f32 to vector<8x1xf32>
    %9 = arith.divf %7, %8 : vector<8x1xf32>
    %10 = vector.broadcast %9 : vector<8x1xf32> to vector<8x32xf32>
    %11 = arith.subf %1, %10 : vector<8x32xf32>
    %12 = arith.mulf %11, %11 : vector<8x32xf32>
    %cst_9 = arith.constant dense<0.000000e+00> : vector<8xf32>
    %13 = vector.multi_reduction <add>, %12, %cst_9 [1] : vector<8x32xf32> to vector<8xf32>
    %14 = vector.shape_cast %13 : vector<8xf32> to vector<8x1xf32>
    %cst_10 = arith.constant 3.200000e+01 : f32
    %15 = vector.broadcast %cst_10 : f32 to vector<8x1xf32>
    %16 = arith.divf %14, %15 : vector<8x1xf32>
    %17 = vector.broadcast %9 : vector<8x1xf32> to vector<8x32xf32>
    %18 = arith.subf %1, %17 : vector<8x32xf32>
    %cst_11 = arith.constant 9.99999974E-6 : f32
    %19 = vector.broadcast %cst_11 : f32 to vector<8x1xf32>
    %20 = arith.addf %16, %19 : vector<8x1xf32>
    %21 = math.rsqrt %20 : vector<8x1xf32>
    %22 = vector.broadcast %21 : vector<8x1xf32> to vector<8x32xf32>
    %23 = arith.mulf %18, %22 : vector<8x32xf32>
    %24 = vector.broadcast %4 : vector<1x32xf32> to vector<8x32xf32>
    %25 = arith.mulf %23, %24 : vector<8x32xf32>
    %26 = vector.broadcast %5 : vector<1x32xf32> to vector<8x32xf32>
    %27 = arith.addf %25, %26 : vector<8x32xf32>
    %28 = arith.truncf %27 : vector<8x32xf32> to vector<8x32xbf16>
    %cst_12 = arith.constant 0.000000e+00 : f32
    %29 = vector.broadcast %cst_12 : f32 to vector<8x32xf32>
    %c0_13 = arith.constant 0 : index
    %c0_14 = arith.constant 0 : index
    %30 = vector.load %arg16[%c0_13, %c0_14] : memref<8x32xf32, #tpu.memory_space<vmem>>, vector<8x32xf32>
    tpu.vector_store %arg16[%c0_13, %c0_14], %29 {strides = array<i32>} : memref<8x32xf32, #tpu.memory_space<vmem>>, vector<8x32xf32>,
    %c0_15 = arith.constant 0 : index
    %c0_16 = arith.constant 0 : index
    %c0_17 = arith.constant 0 : index
    %c0_18 = arith.constant 0 : index
    %31 = vector.load %arg4[%c0_15, %c0_16, %c0_17, %c0_18] : memref<3x4x32x8xbf16, #tpu.memory_space<vmem>>, vector<1x1x32x8xbf16>
    %32 = vector.shape_cast %31 : vector<1x1x32x8xbf16> to vector<32x8xbf16>
    %cst_19 = arith.constant dense<0.000000e+00> : vector<8x8xf32>
    %33 = tpu.matmul %28, %32, %cst_19 {dimension_numbers = #tpu.dot_dimension_numbers<[1], [0], [0], [1], [0, 0, 1, 1], [], []>} : vector<8x32xbf16>, vector<32x8xbf16>, vector<8x8xf32> -> vector<8x8xf32>
    %c0_20 = arith.constant 0 : index
    %c0_21 = arith.constant 0 : index
    %c0_22 = arith.constant 0 : index
    %c0_23 = arith.constant 0 : index
    %34 = vector.load %arg5[%c0_20, %c0_21, %c0_22, %c0_23] : memref<3x4x1x8xf32, #tpu.memory_space<vmem>>, vector<1x1x1x8xf32>
    %35 = vector.shape_cast %34 : vector<1x1x1x8xf32> to vector<1x8xf32>
    %36 = vector.broadcast %35 : vector<1x8xf32> to vector<8x8xf32>
    %37 = arith.addf %33, %36 : vector<8x8xf32>
    %c1 = arith.constant 1 : index
    %c0_24 = arith.constant 0 : index
    %c0_25 = arith.constant 0 : index
    %c0_26 = arith.constant 0 : index
    %38 = vector.load %arg4[%c1, %c0_24, %c0_25, %c0_26] : memref<3x4x32x8xbf16, #tpu.memory_space<vmem>>, vector<1x1x32x8xbf16>
    %39 = vector.shape_cast %38 : vector<1x1x32x8xbf16> to vector<32x8xbf16>
    %cst_27 = arith.constant dense<0.000000e+00> : vector<8x8xf32>
    %40 = tpu.matmul %28, %39, %cst_27 {dimension_numbers = #tpu.dot_dimension_numbers<[1], [0], [0], [1], [0, 0, 1, 1], [], []>} : vector<8x32xbf16>, vector<32x8xbf16>, vector<8x8xf32> -> vector<8x8xf32>
    %c1_28 = arith.constant 1 : index
    %c0_29 = arith.constant 0 : index
    %c0_30 = arith.constant 0 : index
    %c0_31 = arith.constant 0 : index
    %41 = vector.load %arg5[%c1_28, %c0_29, %c0_30, %c0_31] : memref<3x4x1x8xf32, #tpu.memory_space<vmem>>, vector<1x1x1x8xf32>
    %42 = vector.shape_cast %41 : vector<1x1x1x8xf32> to vector<1x8xf32>
    %43 = vector.broadcast %42 : vector<1x8xf32> to vector<8x8xf32>
    %44 = arith.addf %40, %43 : vector<8x8xf32>
    %c2 = arith.constant 2 : index
    %c0_32 = arith.constant 0 : index
    %c0_33 = arith.constant 0 : index
    %c0_34 = arith.constant 0 : index
    %45 = vector.load %arg4[%c2, %c0_32, %c0_33, %c0_34] : memref<3x4x32x8xbf16, #tpu.memory_space<vmem>>, vector<1x1x32x8xbf16>
    %46 = vector.shape_cast %45 : vector<1x1x32x8xbf16> to vector<32x8xbf16>
    %cst_35 = arith.constant dense<0.000000e+00> : vector<8x8xf32>
    %47 = tpu.matmul %28, %46, %cst_35 {dimension_numbers = #tpu.dot_dimension_numbers<[1], [0], [0], [1], [0, 0, 1, 1], [], []>} : vector<8x32xbf16>, vector<32x8xbf16>, vector<8x8xf32> -> vector<8x8xf32>
    %c2_36 = arith.constant 2 : index
    %c0_37 = arith.constant 0 : index
    %c0_38 = arith.constant 0 : index
    %c0_39 = arith.constant 0 : index
    %48 = vector.load %arg5[%c2_36, %c0_37, %c0_38, %c0_39] : memref<3x4x1x8xf32, #tpu.memory_space<vmem>>, vector<1x1x1x8xf32>
    %49 = vector.shape_cast %48 : vector<1x1x1x8xf32> to vector<1x8xf32>
    %50 = vector.broadcast %49 : vector<1x8xf32> to vector<8x8xf32>
    %51 = arith.addf %47, %50 : vector<8x8xf32>
    %52 = arith.truncf %37 : vector<8x8xf32> to vector<8x8xbf16>
    %53 = arith.truncf %44 : vector<8x8xf32> to vector<8x8xbf16>
    %cst_40 = arith.constant dense<0.000000e+00> : vector<8x8xf32>
    %54 = tpu.matmul %52, %53, %cst_40 {dimension_numbers = #tpu.dot_dimension_numbers<[1], [1], [0], [0], [0, 0, 1, 0], [], []>} : vector<8x8xbf16>, vector<8x8xbf16>, vector<8x8xf32> -> vector<8x8xf32>
    %55 = vector.broadcast %3 : f32 to vector<8x8xf32>
    %56 = arith.mulf %54, %55 : vector<8x8xf32>
    %cst_41 = arith.constant dense<0xFF800000> : vector<8xf32>
    %57 = vector.multi_reduction <maximumf>, %56, %cst_41 [1] : vector<8x8xf32> to vector<8xf32>
    %58 = vector.shape_cast %57 : vector<8xf32> to vector<8x1xf32>
    %59 = vector.broadcast %58 : vector<8x1xf32> to vector<8x8xf32>
    %60 = arith.subf %56, %59 : vector<8x8xf32>
    %61 = math.exp %60 : vector<8x8xf32>
    %cst_42 = arith.constant dense<0.000000e+00> : vector<8xf32>
    %62 = vector.multi_reduction <add>, %61, %cst_42 [1] : vector<8x8xf32> to vector<8xf32>
    %63 = vector.shape_cast %62 : vector<8xf32> to vector<8x1xf32>
    %64 = tpu.reciprocal %63 {approx = true} : vector<8x1xf32> -> vector<8x1xf32>
    %65 = vector.broadcast %64 : vector<8x1xf32> to vector<8x8xf32>
    %66 = arith.mulf %61, %65 : vector<8x8xf32>
    %c0_43 = arith.constant 0 : index
    %c0_44 = arith.constant 0 : index
    %c0_45 = arith.constant 0 : index
    %c0_46 = arith.constant 0 : index
    %67 = vector.load %arg15[%c0_43, %c0_44, %c0_45, %c0_46] : memref<1x4x8x8xf32, #tpu.memory_space<vmem>>, vector<1x1x8x8xf32>
    %68 = vector.shape_cast %67 : vector<1x1x8x8xf32> to vector<8x8xf32>
    %69 = vector.shape_cast %66 : vector<8x8xf32> to vector<1x1x8x8xf32>
    tpu.vector_store %arg15[%c0_43, %c0_44, %c0_45, %c0_46], %69 {strides = array<i32>} : memref<1x4x8x8xf32, #tpu.memory_space<vmem>>, vector<1x1x8x8xf32>,
    %70 = arith.truncf %66 : vector<8x8xf32> to vector<8x8xbf16>
    %71 = arith.truncf %51 : vector<8x8xf32> to vector<8x8xbf16>
    %cst_47 = arith.constant dense<0.000000e+00> : vector<8x8xf32>
    %72 = tpu.matmul %70, %71, %cst_47 {dimension_numbers = #tpu.dot_dimension_numbers<[1], [0], [0], [1], [0, 0, 1, 1], [], []>} : vector<8x8xbf16>, vector<8x8xbf16>, vector<8x8xf32> -> vector<8x8xf32>
    %c0_48 = arith.constant 0 : index
    %c0_49 = arith.constant 0 : index
    %73 = vector.load %arg16[%c0_48, %c0_49] : memref<8x32xf32, #tpu.memory_space<vmem>>, vector<8x32xf32>
    %74 = arith.truncf %72 : vector<8x8xf32> to vector<8x8xbf16>
    %c0_50 = arith.constant 0 : index
    %c0_51 = arith.constant 0 : index
    %c0_52 = arith.constant 0 : index
    %75 = vector.load %arg6[%c0_50, %c0_51, %c0_52] : memref<4x8x32xbf16, #tpu.memory_space<vmem>>, vector<1x8x32xbf16>
    %76 = vector.shape_cast %75 : vector<1x8x32xbf16> to vector<8x32xbf16>
    %cst_53 = arith.constant dense<0.000000e+00> : vector<8x32xf32>
    %77 = tpu.matmul %74, %76, %cst_53 {dimension_numbers = #tpu.dot_dimension_numbers<[1], [0], [0], [1], [0, 0, 1, 1], [], []>} : vector<8x8xbf16>, vector<8x32xbf16>, vector<8x32xf32> -> vector<8x32xf32>
    %78 = arith.addf %73, %77 : vector<8x32xf32>
    %c0_54 = arith.constant 0 : index
    %c0_55 = arith.constant 0 : index
    %79 = vector.load %arg16[%c0_54, %c0_55] : memref<8x32xf32, #tpu.memory_space<vmem>>, vector<8x32xf32>
    tpu.vector_store %arg16[%c0_54, %c0_55], %78 {strides = array<i32>} : memref<8x32xf32, #tpu.memory_space<vmem>>, vector<8x32xf32>,
    %c0_56 = arith.constant 0 : index
    %c1_57 = arith.constant 1 : index
    %c0_58 = arith.constant 0 : index
    %c0_59 = arith.constant 0 : index
    %80 = vector.load %arg4[%c0_56, %c1_57, %c0_58, %c0_59] : memref<3x4x32x8xbf16, #tpu.memory_space<vmem>>, vector<1x1x32x8xbf16>
    %81 = vector.shape_cast %80 : vector<1x1x32x8xbf16> to vector<32x8xbf16>
    %cst_60 = arith.constant dense<0.000000e+00> : vector<8x8xf32>
    %82 = tpu.matmul %28, %81, %cst_60 {dimension_numbers = #tpu.dot_dimension_numbers<[1], [0], [0], [1], [0, 0, 1, 1], [], []>} : vector<8x32xbf16>, vector<32x8xbf16>, vector<8x8xf32> -> vector<8x8xf32>
    %c0_61 = arith.constant 0 : index
    %c1_62 = arith.constant 1 : index
    %c0_63 = arith.constant 0 : index
    %c0_64 = arith.constant 0 : index
    %83 = vector.load %arg5[%c0_61, %c1_62, %c0_63, %c0_64] : memref<3x4x1x8xf32, #tpu.memory_space<vmem>>, vector<1x1x1x8xf32>
    %84 = vector.shape_cast %83 : vector<1x1x1x8xf32> to vector<1x8xf32>
    %85 = vector.broadcast %84 : vector<1x8xf32> to vector<8x8xf32>
    %86 = arith.addf %82, %85 : vector<8x8xf32>
    %c1_65 = arith.constant 1 : index
    %c1_66 = arith.constant 1 : index
    %c0_67 = arith.constant 0 : index
    %c0_68 = arith.constant 0 : index
    %87 = vector.load %arg4[%c1_65, %c1_66, %c0_67, %c0_68] : memref<3x4x32x8xbf16, #tpu.memory_space<vmem>>, vector<1x1x32x8xbf16>
    %88 = vector.shape_cast %87 : vector<1x1x32x8xbf16> to vector<32x8xbf16>
    %cst_69 = arith.constant dense<0.000000e+00> : vector<8x8xf32>
    %89 = tpu.matmul %28, %88, %cst_69 {dimension_numbers = #tpu.dot_dimension_numbers<[1], [0], [0], [1], [0, 0, 1, 1], [], []>} : vector<8x32xbf16>, vector<32x8xbf16>, vector<8x8xf32> -> vector<8x8xf32>
    %c1_70 = arith.constant 1 : index
    %c1_71 = arith.constant 1 : index
    %c0_72 = arith.constant 0 : index
    %c0_73 = arith.constant 0 : index
    %90 = vector.load %arg5[%c1_70, %c1_71, %c0_72, %c0_73] : memref<3x4x1x8xf32, #tpu.memory_space<vmem>>, vector<1x1x1x8xf32>
    %91 = vector.shape_cast %90 : vector<1x1x1x8xf32> to vector<1x8xf32>
    %92 = vector.broadcast %91 : vector<1x8xf32> to vector<8x8xf32>
    %93 = arith.addf %89, %92 : vector<8x8xf32>
    %c2_74 = arith.constant 2 : index
    %c1_75 = arith.constant 1 : index
    %c0_76 = arith.constant 0 : index
    %c0_77 = arith.constant 0 : index
    %94 = vector.load %arg4[%c2_74, %c1_75, %c0_76, %c0_77] : memref<3x4x32x8xbf16, #tpu.memory_space<vmem>>, vector<1x1x32x8xbf16>
    %95 = vector.shape_cast %94 : vector<1x1x32x8xbf16> to vector<32x8xbf16>
    %cst_78 = arith.constant dense<0.000000e+00> : vector<8x8xf32>
    %96 = tpu.matmul %28, %95, %cst_78 {dimension_numbers = #tpu.dot_dimension_numbers<[1], [0], [0], [1], [0, 0, 1, 1], [], []>} : vector<8x32xbf16>, vector<32x8xbf16>, vector<8x8xf32> -> vector<8x8xf32>
    %c2_79 = arith.constant 2 : index
    %c1_80 = arith.constant 1 : index
    %c0_81 = arith.constant 0 : index
    %c0_82 = arith.constant 0 : index
    %97 = vector.load %arg5[%c2_79, %c1_80, %c0_81, %c0_82] : memref<3x4x1x8xf32, #tpu.memory_space<vmem>>, vector<1x1x1x8xf32>
    %98 = vector.shape_cast %97 : vector<1x1x1x8xf32> to vector<1x8xf32>
    %99 = vector.broadcast %98 : vector<1x8xf32> to vector<8x8xf32>
    %100 = arith.addf %96, %99 : vector<8x8xf32>
    %101 = arith.truncf %86 : vector<8x8xf32> to vector<8x8xbf16>
    %102 = arith.truncf %93 : vector<8x8xf32> to vector<8x8xbf16>
    %cst_83 = arith.constant dense<0.000000e+00> : vector<8x8xf32>
    %103 = tpu.matmul %101, %102, %cst_83 {dimension_numbers = #tpu.dot_dimension_numbers<[1], [1], [0], [0], [0, 0, 1, 0], [], []>} : vector<8x8xbf16>, vector<8x8xbf16>, vector<8x8xf32> -> vector<8x8xf32>
    %104 = vector.broadcast %3 : f32 to vector<8x8xf32>
    %105 = arith.mulf %103, %104 : vector<8x8xf32>
    %cst_84 = arith.constant dense<0xFF800000> : vector<8xf32>
    %106 = vector.multi_reduction <maximumf>, %105, %cst_84 [1] : vector<8x8xf32> to vector<8xf32>
    %107 = vector.shape_cast %106 : vector<8xf32> to vector<8x1xf32>
    %108 = vector.broadcast %107 : vector<8x1xf32> to vector<8x8xf32>
    %109 = arith.subf %105, %108 : vector<8x8xf32>
    %110 = math.exp %109 : vector<8x8xf32>
    %cst_85 = arith.constant dense<0.000000e+00> : vector<8xf32>
    %111 = vector.multi_reduction <add>, %110, %cst_85 [1] : vector<8x8xf32> to vector<8xf32>
    %112 = vector.shape_cast %111 : vector<8xf32> to vector<8x1xf32>
    %113 = tpu.reciprocal %112 {approx = true} : vector<8x1xf32> -> vector<8x1xf32>
    %114 = vector.broadcast %113 : vector<8x1xf32> to vector<8x8xf32>
    %115 = arith.mulf %110, %114 : vector<8x8xf32>
    %c0_86 = arith.constant 0 : index
    %c1_87 = arith.constant 1 : index
    %c0_88 = arith.constant 0 : index
    %c0_89 = arith.constant 0 : index
    %116 = vector.load %arg15[%c0_86, %c1_87, %c0_88, %c0_89] : memref<1x4x8x8xf32, #tpu.memory_space<vmem>>, vector<1x1x8x8xf32>
    %117 = vector.shape_cast %116 : vector<1x1x8x8xf32> to vector<8x8xf32>
    %118 = vector.shape_cast %115 : vector<8x8xf32> to vector<1x1x8x8xf32>
    tpu.vector_store %arg15[%c0_86, %c1_87, %c0_88, %c0_89], %118 {strides = array<i32>} : memref<1x4x8x8xf32, #tpu.memory_space<vmem>>, vector<1x1x8x8xf32>,
    %119 = arith.truncf %115 : vector<8x8xf32> to vector<8x8xbf16>
    %120 = arith.truncf %100 : vector<8x8xf32> to vector<8x8xbf16>
    %cst_90 = arith.constant dense<0.000000e+00> : vector<8x8xf32>
    %121 = tpu.matmul %119, %120, %cst_90 {dimension_numbers = #tpu.dot_dimension_numbers<[1], [0], [0], [1], [0, 0, 1, 1], [], []>} : vector<8x8xbf16>, vector<8x8xbf16>, vector<8x8xf32> -> vector<8x8xf32>
    %c0_91 = arith.constant 0 : index
    %c0_92 = arith.constant 0 : index
    %122 = vector.load %arg16[%c0_91, %c0_92] : memref<8x32xf32, #tpu.memory_space<vmem>>, vector<8x32xf32>
    %123 = arith.truncf %121 : vector<8x8xf32> to vector<8x8xbf16>
    %c1_93 = arith.constant 1 : index
    %c0_94 = arith.constant 0 : index
    %c0_95 = arith.constant 0 : index
    %124 = vector.load %arg6[%c1_93, %c0_94, %c0_95] : memref<4x8x32xbf16, #tpu.memory_space<vmem>>, vector<1x8x32xbf16>
    %125 = vector.shape_cast %124 : vector<1x8x32xbf16> to vector<8x32xbf16>
    %cst_96 = arith.constant dense<0.000000e+00> : vector<8x32xf32>
    %126 = tpu.matmul %123, %125, %cst_96 {dimension_numbers = #tpu.dot_dimension_numbers<[1], [0], [0], [1], [0, 0, 1, 1], [], []>} : vector<8x8xbf16>, vector<8x32xbf16>, vector<8x32xf32> -> vector<8x32xf32>
    %127 = arith.addf %122, %126 : vector<8x32xf32>
    %c0_97 = arith.constant 0 : index
    %c0_98 = arith.constant 0 : index
    %128 = vector.load %arg16[%c0_97, %c0_98] : memref<8x32xf32, #tpu.memory_space<vmem>>, vector<8x32xf32>
    tpu.vector_store %arg16[%c0_97, %c0_98], %127 {strides = array<i32>} : memref<8x32xf32, #tpu.memory_space<vmem>>, vector<8x32xf32>,
    %c0_99 = arith.constant 0 : index
    %c2_100 = arith.constant 2 : index
    %c0_101 = arith.constant 0 : index
    %c0_102 = arith.constant 0 : index
    %129 = vector.load %arg4[%c0_99, %c2_100, %c0_101, %c0_102] : memref<3x4x32x8xbf16, #tpu.memory_space<vmem>>, vector<1x1x32x8xbf16>
    %130 = vector.shape_cast %129 : vector<1x1x32x8xbf16> to vector<32x8xbf16>
    %cst_103 = arith.constant dense<0.000000e+00> : vector<8x8xf32>
    %131 = tpu.matmul %28, %130, %cst_103 {dimension_numbers = #tpu.dot_dimension_numbers<[1], [0], [0], [1], [0, 0, 1, 1], [], []>} : vector<8x32xbf16>, vector<32x8xbf16>, vector<8x8xf32> -> vector<8x8xf32>
    %c0_104 = arith.constant 0 : index
    %c2_105 = arith.constant 2 : index
    %c0_106 = arith.constant 0 : index
    %c0_107 = arith.constant 0 : index
    %132 = vector.load %arg5[%c0_104, %c2_105, %c0_106, %c0_107] : memref<3x4x1x8xf32, #tpu.memory_space<vmem>>, vector<1x1x1x8xf32>
    %133 = vector.shape_cast %132 : vector<1x1x1x8xf32> to vector<1x8xf32>
    %134 = vector.broadcast %133 : vector<1x8xf32> to vector<8x8xf32>
    %135 = arith.addf %131, %134 : vector<8x8xf32>
    %c1_108 = arith.constant 1 : index
    %c2_109 = arith.constant 2 : index
    %c0_110 = arith.constant 0 : index
    %c0_111 = arith.constant 0 : index
    %136 = vector.load %arg4[%c1_108, %c2_109, %c0_110, %c0_111] : memref<3x4x32x8xbf16, #tpu.memory_space<vmem>>, vector<1x1x32x8xbf16>
    %137 = vector.shape_cast %136 : vector<1x1x32x8xbf16> to vector<32x8xbf16>
    %cst_112 = arith.constant dense<0.000000e+00> : vector<8x8xf32>
    %138 = tpu.matmul %28, %137, %cst_112 {dimension_numbers = #tpu.dot_dimension_numbers<[1], [0], [0], [1], [0, 0, 1, 1], [], []>} : vector<8x32xbf16>, vector<32x8xbf16>, vector<8x8xf32> -> vector<8x8xf32>
    %c1_113 = arith.constant 1 : index
    %c2_114 = arith.constant 2 : index
    %c0_115 = arith.constant 0 : index
    %c0_116 = arith.constant 0 : index
    %139 = vector.load %arg5[%c1_113, %c2_114, %c0_115, %c0_116] : memref<3x4x1x8xf32, #tpu.memory_space<vmem>>, vector<1x1x1x8xf32>
    %140 = vector.shape_cast %139 : vector<1x1x1x8xf32> to vector<1x8xf32>
    %141 = vector.broadcast %140 : vector<1x8xf32> to vector<8x8xf32>
    %142 = arith.addf %138, %141 : vector<8x8xf32>
    %c2_117 = arith.constant 2 : index
    %c2_118 = arith.constant 2 : index
    %c0_119 = arith.constant 0 : index
    %c0_120 = arith.constant 0 : index
    %143 = vector.load %arg4[%c2_117, %c2_118, %c0_119, %c0_120] : memref<3x4x32x8xbf16, #tpu.memory_space<vmem>>, vector<1x1x32x8xbf16>
    %144 = vector.shape_cast %143 : vector<1x1x32x8xbf16> to vector<32x8xbf16>
    %cst_121 = arith.constant dense<0.000000e+00> : vector<8x8xf32>
    %145 = tpu.matmul %28, %144, %cst_121 {dimension_numbers = #tpu.dot_dimension_numbers<[1], [0], [0], [1], [0, 0, 1, 1], [], []>} : vector<8x32xbf16>, vector<32x8xbf16>, vector<8x8xf32> -> vector<8x8xf32>
    %c2_122 = arith.constant 2 : index
    %c2_123 = arith.constant 2 : index
    %c0_124 = arith.constant 0 : index
    %c0_125 = arith.constant 0 : index
    %146 = vector.load %arg5[%c2_122, %c2_123, %c0_124, %c0_125] : memref<3x4x1x8xf32, #tpu.memory_space<vmem>>, vector<1x1x1x8xf32>
    %147 = vector.shape_cast %146 : vector<1x1x1x8xf32> to vector<1x8xf32>
    %148 = vector.broadcast %147 : vector<1x8xf32> to vector<8x8xf32>
    %149 = arith.addf %145, %148 : vector<8x8xf32>
    %150 = arith.truncf %135 : vector<8x8xf32> to vector<8x8xbf16>
    %151 = arith.truncf %142 : vector<8x8xf32> to vector<8x8xbf16>
    %cst_126 = arith.constant dense<0.000000e+00> : vector<8x8xf32>
    %152 = tpu.matmul %150, %151, %cst_126 {dimension_numbers = #tpu.dot_dimension_numbers<[1], [1], [0], [0], [0, 0, 1, 0], [], []>} : vector<8x8xbf16>, vector<8x8xbf16>, vector<8x8xf32> -> vector<8x8xf32>
    %153 = vector.broadcast %3 : f32 to vector<8x8xf32>
    %154 = arith.mulf %152, %153 : vector<8x8xf32>
    %cst_127 = arith.constant dense<0xFF800000> : vector<8xf32>
    %155 = vector.multi_reduction <maximumf>, %154, %cst_127 [1] : vector<8x8xf32> to vector<8xf32>
    %156 = vector.shape_cast %155 : vector<8xf32> to vector<8x1xf32>
    %157 = vector.broadcast %156 : vector<8x1xf32> to vector<8x8xf32>
    %158 = arith.subf %154, %157 : vector<8x8xf32>
    %159 = math.exp %158 : vector<8x8xf32>
    %cst_128 = arith.constant dense<0.000000e+00> : vector<8xf32>
    %160 = vector.multi_reduction <add>, %159, %cst_128 [1] : vector<8x8xf32> to vector<8xf32>
    %161 = vector.shape_cast %160 : vector<8xf32> to vector<8x1xf32>
    %162 = tpu.reciprocal %161 {approx = true} : vector<8x1xf32> -> vector<8x1xf32>
    %163 = vector.broadcast %162 : vector<8x1xf32> to vector<8x8xf32>
    %164 = arith.mulf %159, %163 : vector<8x8xf32>
    %c0_129 = arith.constant 0 : index
    %c2_130 = arith.constant 2 : index
    %c0_131 = arith.constant 0 : index
    %c0_132 = arith.constant 0 : index
    %165 = vector.load %arg15[%c0_129, %c2_130, %c0_131, %c0_132] : memref<1x4x8x8xf32, #tpu.memory_space<vmem>>, vector<1x1x8x8xf32>
    %166 = vector.shape_cast %165 : vector<1x1x8x8xf32> to vector<8x8xf32>
    %167 = vector.shape_cast %164 : vector<8x8xf32> to vector<1x1x8x8xf32>
    tpu.vector_store %arg15[%c0_129, %c2_130, %c0_131, %c0_132], %167 {strides = array<i32>} : memref<1x4x8x8xf32, #tpu.memory_space<vmem>>, vector<1x1x8x8xf32>,
    %168 = arith.truncf %164 : vector<8x8xf32> to vector<8x8xbf16>
    %169 = arith.truncf %149 : vector<8x8xf32> to vector<8x8xbf16>
    %cst_133 = arith.constant dense<0.000000e+00> : vector<8x8xf32>
    %170 = tpu.matmul %168, %169, %cst_133 {dimension_numbers = #tpu.dot_dimension_numbers<[1], [0], [0], [1], [0, 0, 1, 1], [], []>} : vector<8x8xbf16>, vector<8x8xbf16>, vector<8x8xf32> -> vector<8x8xf32>
    %c0_134 = arith.constant 0 : index
    %c0_135 = arith.constant 0 : index
    %171 = vector.load %arg16[%c0_134, %c0_135] : memref<8x32xf32, #tpu.memory_space<vmem>>, vector<8x32xf32>
    %172 = arith.truncf %170 : vector<8x8xf32> to vector<8x8xbf16>
    %c2_136 = arith.constant 2 : index
    %c0_137 = arith.constant 0 : index
    %c0_138 = arith.constant 0 : index
    %173 = vector.load %arg6[%c2_136, %c0_137, %c0_138] : memref<4x8x32xbf16, #tpu.memory_space<vmem>>, vector<1x8x32xbf16>
    %174 = vector.shape_cast %173 : vector<1x8x32xbf16> to vector<8x32xbf16>
    %cst_139 = arith.constant dense<0.000000e+00> : vector<8x32xf32>
    %175 = tpu.matmul %172, %174, %cst_139 {dimension_numbers = #tpu.dot_dimension_numbers<[1], [0], [0], [1], [0, 0, 1, 1], [], []>} : vector<8x8xbf16>, vector<8x32xbf16>, vector<8x32xf32> -> vector<8x32xf32>
    %176 = arith.addf %171, %175 : vector<8x32xf32>
    %c0_140 = arith.constant 0 : index
    %c0_141 = arith.constant 0 : index
    %177 = vector.load %arg16[%c0_140, %c0_141] : memref<8x32xf32, #tpu.memory_space<vmem>>, vector<8x32xf32>
    tpu.vector_store %arg16[%c0_140, %c0_141], %176 {strides = array<i32>} : memref<8x32xf32, #tpu.memory_space<vmem>>, vector<8x32xf32>,
    %c0_142 = arith.constant 0 : index
    %c3 = arith.constant 3 : index
    %c0_143 = arith.constant 0 : index
    %c0_144 = arith.constant 0 : index
    %178 = vector.load %arg4[%c0_142, %c3, %c0_143, %c0_144] : memref<3x4x32x8xbf16, #tpu.memory_space<vmem>>, vector<1x1x32x8xbf16>
    %179 = vector.shape_cast %178 : vector<1x1x32x8xbf16> to vector<32x8xbf16>
    %cst_145 = arith.constant dense<0.000000e+00> : vector<8x8xf32>
    %180 = tpu.matmul %28, %179, %cst_145 {dimension_numbers = #tpu.dot_dimension_numbers<[1], [0], [0], [1], [0, 0, 1, 1], [], []>} : vector<8x32xbf16>, vector<32x8xbf16>, vector<8x8xf32> -> vector<8x8xf32>
    %c0_146 = arith.constant 0 : index
    %c3_147 = arith.constant 3 : index
    %c0_148 = arith.constant 0 : index
    %c0_149 = arith.constant 0 : index
    %181 = vector.load %arg5[%c0_146, %c3_147, %c0_148, %c0_149] : memref<3x4x1x8xf32, #tpu.memory_space<vmem>>, vector<1x1x1x8xf32>
    %182 = vector.shape_cast %181 : vector<1x1x1x8xf32> to vector<1x8xf32>
    %183 = vector.broadcast %182 : vector<1x8xf32> to vector<8x8xf32>
    %184 = arith.addf %180, %183 : vector<8x8xf32>
    %c1_150 = arith.constant 1 : index
    %c3_151 = arith.constant 3 : index
    %c0_152 = arith.constant 0 : index
    %c0_153 = arith.constant 0 : index
    %185 = vector.load %arg4[%c1_150, %c3_151, %c0_152, %c0_153] : memref<3x4x32x8xbf16, #tpu.memory_space<vmem>>, vector<1x1x32x8xbf16>
    %186 = vector.shape_cast %185 : vector<1x1x32x8xbf16> to vector<32x8xbf16>
    %cst_154 = arith.constant dense<0.000000e+00> : vector<8x8xf32>
    %187 = tpu.matmul %28, %186, %cst_154 {dimension_numbers = #tpu.dot_dimension_numbers<[1], [0], [0], [1], [0, 0, 1, 1], [], []>} : vector<8x32xbf16>, vector<32x8xbf16>, vector<8x8xf32> -> vector<8x8xf32>
    %c1_155 = arith.constant 1 : index
    %c3_156 = arith.constant 3 : index
    %c0_157 = arith.constant 0 : index
    %c0_158 = arith.constant 0 : index
    %188 = vector.load %arg5[%c1_155, %c3_156, %c0_157, %c0_158] : memref<3x4x1x8xf32, #tpu.memory_space<vmem>>, vector<1x1x1x8xf32>
    %189 = vector.shape_cast %188 : vector<1x1x1x8xf32> to vector<1x8xf32>
    %190 = vector.broadcast %189 : vector<1x8xf32> to vector<8x8xf32>
    %191 = arith.addf %187, %190 : vector<8x8xf32>
    %c2_159 = arith.constant 2 : index
    %c3_160 = arith.constant 3 : index
    %c0_161 = arith.constant 0 : index
    %c0_162 = arith.constant 0 : index
    %192 = vector.load %arg4[%c2_159, %c3_160, %c0_161, %c0_162] : memref<3x4x32x8xbf16, #tpu.memory_space<vmem>>, vector<1x1x32x8xbf16>
    %193 = vector.shape_cast %192 : vector<1x1x32x8xbf16> to vector<32x8xbf16>
    %cst_163 = arith.constant dense<0.000000e+00> : vector<8x8xf32>
    %194 = tpu.matmul %28, %193, %cst_163 {dimension_numbers = #tpu.dot_dimension_numbers<[1], [0], [0], [1], [0, 0, 1, 1], [], []>} : vector<8x32xbf16>, vector<32x8xbf16>, vector<8x8xf32> -> vector<8x8xf32>
    %c2_164 = arith.constant 2 : index
    %c3_165 = arith.constant 3 : index
    %c0_166 = arith.constant 0 : index
    %c0_167 = arith.constant 0 : index
    %195 = vector.load %arg5[%c2_164, %c3_165, %c0_166, %c0_167] : memref<3x4x1x8xf32, #tpu.memory_space<vmem>>, vector<1x1x1x8xf32>
    %196 = vector.shape_cast %195 : vector<1x1x1x8xf32> to vector<1x8xf32>
    %197 = vector.broadcast %196 : vector<1x8xf32> to vector<8x8xf32>
    %198 = arith.addf %194, %197 : vector<8x8xf32>
    %199 = arith.truncf %184 : vector<8x8xf32> to vector<8x8xbf16>
    %200 = arith.truncf %191 : vector<8x8xf32> to vector<8x8xbf16>
    %cst_168 = arith.constant dense<0.000000e+00> : vector<8x8xf32>
    %201 = tpu.matmul %199, %200, %cst_168 {dimension_numbers = #tpu.dot_dimension_numbers<[1], [1], [0], [0], [0, 0, 1, 0], [], []>} : vector<8x8xbf16>, vector<8x8xbf16>, vector<8x8xf32> -> vector<8x8xf32>
    %202 = vector.broadcast %3 : f32 to vector<8x8xf32>
    %203 = arith.mulf %201, %202 : vector<8x8xf32>
    %cst_169 = arith.constant dense<0xFF800000> : vector<8xf32>
    %204 = vector.multi_reduction <maximumf>, %203, %cst_169 [1] : vector<8x8xf32> to vector<8xf32>
    %205 = vector.shape_cast %204 : vector<8xf32> to vector<8x1xf32>
    %206 = vector.broadcast %205 : vector<8x1xf32> to vector<8x8xf32>
    %207 = arith.subf %203, %206 : vector<8x8xf32>
    %208 = math.exp %207 : vector<8x8xf32>
    %cst_170 = arith.constant dense<0.000000e+00> : vector<8xf32>
    %209 = vector.multi_reduction <add>, %208, %cst_170 [1] : vector<8x8xf32> to vector<8xf32>
    %210 = vector.shape_cast %209 : vector<8xf32> to vector<8x1xf32>
    %211 = tpu.reciprocal %210 {approx = true} : vector<8x1xf32> -> vector<8x1xf32>
    %212 = vector.broadcast %211 : vector<8x1xf32> to vector<8x8xf32>
    %213 = arith.mulf %208, %212 : vector<8x8xf32>
    %c0_171 = arith.constant 0 : index
    %c3_172 = arith.constant 3 : index
    %c0_173 = arith.constant 0 : index
    %c0_174 = arith.constant 0 : index
    %214 = vector.load %arg15[%c0_171, %c3_172, %c0_173, %c0_174] : memref<1x4x8x8xf32, #tpu.memory_space<vmem>>, vector<1x1x8x8xf32>
    %215 = vector.shape_cast %214 : vector<1x1x8x8xf32> to vector<8x8xf32>
    %216 = vector.shape_cast %213 : vector<8x8xf32> to vector<1x1x8x8xf32>
    tpu.vector_store %arg15[%c0_171, %c3_172, %c0_173, %c0_174], %216 {strides = array<i32>} : memref<1x4x8x8xf32, #tpu.memory_space<vmem>>, vector<1x1x8x8xf32>,
    %217 = arith.truncf %213 : vector<8x8xf32> to vector<8x8xbf16>
    %218 = arith.truncf %198 : vector<8x8xf32> to vector<8x8xbf16>
    %cst_175 = arith.constant dense<0.000000e+00> : vector<8x8xf32>
    %219 = tpu.matmul %217, %218, %cst_175 {dimension_numbers = #tpu.dot_dimension_numbers<[1], [0], [0], [1], [0, 0, 1, 1], [], []>} : vector<8x8xbf16>, vector<8x8xbf16>, vector<8x8xf32> -> vector<8x8xf32>
    %c0_176 = arith.constant 0 : index
    %c0_177 = arith.constant 0 : index
    %220 = vector.load %arg16[%c0_176, %c0_177] : memref<8x32xf32, #tpu.memory_space<vmem>>, vector<8x32xf32>
    %221 = arith.truncf %219 : vector<8x8xf32> to vector<8x8xbf16>
    %c3_178 = arith.constant 3 : index
    %c0_179 = arith.constant 0 : index
    %c0_180 = arith.constant 0 : index
    %222 = vector.load %arg6[%c3_178, %c0_179, %c0_180] : memref<4x8x32xbf16, #tpu.memory_space<vmem>>, vector<1x8x32xbf16>
    %223 = vector.shape_cast %222 : vector<1x8x32xbf16> to vector<8x32xbf16>
    %cst_181 = arith.constant dense<0.000000e+00> : vector<8x32xf32>
    %224 = tpu.matmul %221, %223, %cst_181 {dimension_numbers = #tpu.dot_dimension_numbers<[1], [0], [0], [1], [0, 0, 1, 1], [], []>} : vector<8x8xbf16>, vector<8x32xbf16>, vector<8x32xf32> -> vector<8x32xf32>
    %225 = arith.addf %220, %224 : vector<8x32xf32>
    %c0_182 = arith.constant 0 : index
    %c0_183 = arith.constant 0 : index
    %226 = vector.load %arg16[%c0_182, %c0_183] : memref<8x32xf32, #tpu.memory_space<vmem>>, vector<8x32xf32>
    tpu.vector_store %arg16[%c0_182, %c0_183], %225 {strides = array<i32>} : memref<8x32xf32, #tpu.memory_space<vmem>>, vector<8x32xf32>,
    %c0_184 = arith.constant 0 : index
    %c0_185 = arith.constant 0 : index
    %227 = vector.load %arg16[%c0_184, %c0_185] : memref<8x32xf32, #tpu.memory_space<vmem>>, vector<8x32xf32>
    %228 = arith.addf %1, %227 : vector<8x32xf32>
    %c0_186 = arith.constant 0 : index
    %c0_187 = arith.constant 0 : index
    %229 = vector.load %arg7[%c0_186, %c0_187] : memref<1x32xf32, #tpu.memory_space<vmem>>, vector<1x32xf32>
    %230 = vector.broadcast %229 : vector<1x32xf32> to vector<8x32xf32>
    %231 = arith.addf %228, %230 : vector<8x32xf32>
    %c0_188 = arith.constant 0 : index
    %c0_189 = arith.constant 0 : index
    %232 = vector.load %arg8[%c0_188, %c0_189] : memref<1x32xf32, #tpu.memory_space<vmem>>, vector<1x32xf32>
    %c0_190 = arith.constant 0 : index
    %c0_191 = arith.constant 0 : index
    %233 = vector.load %arg9[%c0_190, %c0_191] : memref<1x32xf32, #tpu.memory_space<vmem>>, vector<1x32xf32>
    %cst_192 = arith.constant dense<0.000000e+00> : vector<8xf32>
    %234 = vector.multi_reduction <add>, %231, %cst_192 [1] : vector<8x32xf32> to vector<8xf32>
    %235 = vector.shape_cast %234 : vector<8xf32> to vector<8x1xf32>
    %cst_193 = arith.constant 3.200000e+01 : f32
    %236 = vector.broadcast %cst_193 : f32 to vector<8x1xf32>
    %237 = arith.divf %235, %236 : vector<8x1xf32>
    %238 = vector.broadcast %237 : vector<8x1xf32> to vector<8x32xf32>
    %239 = arith.subf %231, %238 : vector<8x32xf32>
    %240 = arith.mulf %239, %239 : vector<8x32xf32>
    %cst_194 = arith.constant dense<0.000000e+00> : vector<8xf32>
    %241 = vector.multi_reduction <add>, %240, %cst_194 [1] : vector<8x32xf32> to vector<8xf32>
    %242 = vector.shape_cast %241 : vector<8xf32> to vector<8x1xf32>
    %cst_195 = arith.constant 3.200000e+01 : f32
    %243 = vector.broadcast %cst_195 : f32 to vector<8x1xf32>
    %244 = arith.divf %242, %243 : vector<8x1xf32>
    %245 = vector.broadcast %237 : vector<8x1xf32> to vector<8x32xf32>
    %246 = arith.subf %231, %245 : vector<8x32xf32>
    %cst_196 = arith.constant 9.99999974E-6 : f32
    %247 = vector.broadcast %cst_196 : f32 to vector<8x1xf32>
    %248 = arith.addf %244, %247 : vector<8x1xf32>
    %249 = math.rsqrt %248 : vector<8x1xf32>
    %250 = vector.broadcast %249 : vector<8x1xf32> to vector<8x32xf32>
    %251 = arith.mulf %246, %250 : vector<8x32xf32>
    %252 = vector.broadcast %232 : vector<1x32xf32> to vector<8x32xf32>
    %253 = arith.mulf %251, %252 : vector<8x32xf32>
    %254 = vector.broadcast %233 : vector<1x32xf32> to vector<8x32xf32>
    %255 = arith.addf %253, %254 : vector<8x32xf32>
    %256 = arith.truncf %255 : vector<8x32xf32> to vector<8x32xbf16>
    %c0_197 = arith.constant 0 : index
    %c0_198 = arith.constant 0 : index
    %257 = vector.load %arg10[%c0_197, %c0_198] : memref<32x64xbf16, #tpu.memory_space<vmem>>, vector<32x64xbf16>
    %cst_199 = arith.constant dense<0.000000e+00> : vector<8x64xf32>
    %258 = tpu.matmul %256, %257, %cst_199 {dimension_numbers = #tpu.dot_dimension_numbers<[1], [0], [0], [1], [0, 0, 1, 1], [], []>} : vector<8x32xbf16>, vector<32x64xbf16>, vector<8x64xf32> -> vector<8x64xf32>
    %c0_200 = arith.constant 0 : index
    %c0_201 = arith.constant 0 : index
    %259 = vector.load %arg11[%c0_200, %c0_201] : memref<1x64xf32, #tpu.memory_space<vmem>>, vector<1x64xf32>
    %260 = vector.broadcast %259 : vector<1x64xf32> to vector<8x64xf32>
    %261 = arith.addf %258, %260 : vector<8x64xf32>
    %cst_202 = arith.constant 5.000000e-01 : f32
    %262 = vector.broadcast %cst_202 : f32 to vector<8x64xf32>
    %263 = arith.mulf %262, %261 : vector<8x64xf32>
    %cst_203 = arith.constant 2.000000e+00 : f32
    %264 = math.sqrt %cst_203 : f32
    %cst_204 = arith.constant 1.000000e+00 : f32
    %265 = arith.divf %cst_204, %264 : f32
    %266 = vector.broadcast %265 : f32 to vector<8x64xf32>
    %267 = arith.mulf %261, %266 : vector<8x64xf32>
    %268 = math.erf %267 : vector<8x64xf32>
    %cst_205 = arith.constant 1.000000e+00 : f32
    %269 = vector.broadcast %cst_205 : f32 to vector<8x64xf32>
    %270 = arith.addf %269, %268 : vector<8x64xf32>
    %271 = arith.mulf %263, %270 : vector<8x64xf32>
    %272 = arith.truncf %271 : vector<8x64xf32> to vector<8x64xbf16>
    %c0_206 = arith.constant 0 : index
    %c0_207 = arith.constant 0 : index
    %273 = vector.load %arg12[%c0_206, %c0_207] : memref<64x32xbf16, #tpu.memory_space<vmem>>, vector<64x32xbf16>
    %cst_208 = arith.constant dense<0.000000e+00> : vector<8x32xf32>
    %274 = tpu.matmul %272, %273, %cst_208 {dimension_numbers = #tpu.dot_dimension_numbers<[1], [0], [0], [1], [0, 0, 1, 1], [], []>} : vector<8x64xbf16>, vector<64x32xbf16>, vector<8x32xf32> -> vector<8x32xf32>
    %c0_209 = arith.constant 0 : index
    %c0_210 = arith.constant 0 : index
    %275 = vector.load %arg13[%c0_209, %c0_210] : memref<1x32xf32, #tpu.memory_space<vmem>>, vector<1x32xf32>
    %276 = vector.broadcast %275 : vector<1x32xf32> to vector<8x32xf32>
    %277 = arith.addf %274, %276 : vector<8x32xf32>
    %278 = arith.addf %231, %277 : vector<8x32xf32>
    %c0_211 = arith.constant 0 : index
    %c0_212 = arith.constant 0 : index
    %c0_213 = arith.constant 0 : index
    %279 = vector.load %arg14[%c0_211, %c0_212, %c0_213] : memref<1x8x32xf32, #tpu.memory_space<vmem>>, vector<1x8x32xf32>
    %280 = vector.shape_cast %279 : vector<1x8x32xf32> to vector<8x32xf32>
    %281 = vector.shape_cast %278 : vector<8x32xf32> to vector<1x8x32xf32>
    tpu.vector_store %arg14[%c0_211, %c0_212, %c0_213], %281 {strides = array<i32>} : memref<1x8x32xf32, #tpu.memory_space<vmem>>, vector<1x8x32xf32>,
    return
  }
  func.func @transform_0(%arg0: i32) -> (i32, i32, i32) {
    %c0_i32 = arith.constant 0 : i32
    %c0_i32_0 = arith.constant 0 : i32
    %c0_i32_1 = arith.constant 0 : i32
    return %arg0, %c0_i32, %c0_i32_0 : i32, i32, i32
  }
  func.func @transform_1(%arg0: i32) -> (i32, i32) {
    %c0_i32 = arith.constant 0 : i32
    %c0_i32_0 = arith.constant 0 : i32
    %c0_i32_1 = arith.constant 0 : i32
    return %c0_i32, %c0_i32_0 : i32, i32
  }
  func.func @transform_2(%arg0: i32) -> (i32, i32) {
    %c0_i32 = arith.constant 0 : i32
    %c0_i32_0 = arith.constant 0 : i32
    %c0_i32_1 = arith.constant 0 : i32
    return %c0_i32, %c0_i32_0 : i32, i32
  }
  func.func @transform_3(%arg0: i32) -> (i32, i32, i32, i32) {
    %c0_i32 = arith.constant 0 : i32
    %c0_i32_0 = arith.constant 0 : i32
    %c0_i32_1 = arith.constant 0 : i32
    %c0_i32_2 = arith.constant 0 : i32
    %c0_i32_3 = arith.constant 0 : i32
    return %c0_i32, %c0_i32_0, %c0_i32_1, %c0_i32_2 : i32, i32, i32, i32
  }
  func.func @transform_4(%arg0: i32) -> (i32, i32, i32, i32) {
    %c0_i32 = arith.constant 0 : i32
    %c0_i32_0 = arith.constant 0 : i32
    %c0_i32_1 = arith.constant 0 : i32
    %c0_i32_2 = arith.constant 0 : i32
    %c0_i32_3 = arith.constant 0 : i32
    return %c0_i32, %c0_i32_0, %c0_i32_1, %c0_i32_2 : i32, i32, i32, i32
  }
  func.func @transform_5(%arg0: i32) -> (i32, i32, i32) {
    %c0_i32 = arith.constant 0 : i32
    %c0_i32_0 = arith.constant 0 : i32
    %c0_i32_1 = arith.constant 0 : i32
    %c0_i32_2 = arith.constant 0 : i32
    return %c0_i32, %c0_i32_0, %c0_i32_1 : i32, i32, i32
  }
  func.func @transform_6(%arg0: i32) -> (i32, i32) {
    %c0_i32 = arith.constant 0 : i32
    %c0_i32_0 = arith.constant 0 : i32
    %c0_i32_1 = arith.constant 0 : i32
    return %c0_i32, %c0_i32_0 : i32, i32
  }
  func.func @transform_7(%arg0: i32) -> (i32, i32) {
    %c0_i32 = arith.constant 0 : i32
    %c0_i32_0 = arith.constant 0 : i32
    %c0_i32_1 = arith.constant 0 : i32
    return %c0_i32, %c0_i32_0 : i32, i32
  }
  func.func @transform_8(%arg0: i32) -> (i32, i32) {
    %c0_i32 = arith.constant 0 : i32
    %c0_i32_0 = arith.constant 0 : i32
    %c0_i32_1 = arith.constant 0 : i32
    return %c0_i32, %c0_i32_0 : i32, i32
  }
  func.func @transform_9(%arg0: i32) -> (i32, i32) {
    %c0_i32 = arith.constant 0 : i32
    %c0_i32_0 = arith.constant 0 : i32
    %c0_i32_1 = arith.constant 0 : i32
    return %c0_i32, %c0_i32_0 : i32, i32
  }
  func.func @transform_10(%arg0: i32) -> (i32, i32) {
    %c0_i32 = arith.constant 0 : i32
    %c0_i32_0 = arith.constant 0 : i32
    %c0_i32_1 = arith.constant 0 : i32
    return %c0_i32, %c0_i32_0 : i32, i32
  }
  func.func @transform_11(%arg0: i32) -> (i32, i32) {
    %c0_i32 = arith.constant 0 : i32
    %c0_i32_0 = arith.constant 0 : i32
    %c0_i32_1 = arith.constant 0 : i32
    return %c0_i32, %c0_i32_0 : i32, i32
  }
  func.func @transform_12(%arg0: i32) -> (i32, i32) {
    %c0_i32 = arith.constant 0 : i32
    %c0_i32_0 = arith.constant 0 : i32
    %c0_i32_1 = arith.constant 0 : i32
    return %c0_i32, %c0_i32_0 : i32, i32
  }
  func.func @transform_13(%arg0: i32) -> (i32, i32, i32) {
    %c0_i32 = arith.constant 0 : i32
    %c0_i32_0 = arith.constant 0 : i32
    %c0_i32_1 = arith.constant 0 : i32
    return %arg0, %c0_i32, %c0_i32_0 : i32, i32, i32
  }
  func.func @transform_14(%arg0: i32) -> (i32, i32, i32, i32) {
    %c0_i32 = arith.constant 0 : i32
    %c0_i32_0 = arith.constant 0 : i32
    %c0_i32_1 = arith.constant 0 : i32
    %c0_i32_2 = arith.constant 0 : i32
    return %arg0, %c0_i32, %c0_i32_0, %c0_i32_1 : i32, i32, i32, i32
  }
}

</mosaic_0001>

<bundles_post_ra>
// kernel: tpu_custom_call.1
= control target key start
LH: loop header
LB: loop body
LE: loop exit
PB: predicated region body
PF: predicated region fallthrough
CT: control target
= control target key end

     0   :  { %s3426_s0 = inlined_call_operand.vmem [shape: f32[2,8,32], index: 0, kind: input, shape index: {}]   ;;  %s3427_s1 = inlined_call_operand.vmem [shape: f32[1,32], index: 1, kind: input, shape index: {}]   ;;  %s3428_s2 = inlined_call_operand.vmem [shape: f32[1,32], index: 2, kind: input, shape index: {}]   ;;  %s3429_s3 = inlined_call_operand.vmem [shape: bf16[3,4,32,8], index: 3, kind: input, shape index: {}]   ;;  %s3430_s4 = inlined_call_operand.vmem [shape: f32[3,4,1,8], index: 4, kind: input, shape index: {}]   ;;  %s3431_s5 = inlined_call_operand.vmem [shape: bf16[4,8,32], index: 5, kind: input, shape index: {}]   ;;  %s3432_s6 = inlined_call_operand.vmem [shape: f32[1,32], index: 6, kind: input, shape index: {}]   ;;  %s3433_s7 = inlined_call_operand.vmem [shape: f32[1,32], index: 7, kind: input, shape index: {}]   ;;  %s3434_s8 = inlined_call_operand.vmem [shape: f32[1,32], index: 8, kind: input, shape index: {}]   ;;  %s3435_s9 = inlined_call_operand.vmem [shape: bf16[32,64], index: 9, kind: input, shape index: {}]   ;;  %s3436_s10 = inlined_call_operand.vmem [shape: f32[1,64], index: 10, kind: input, shape index: {}]   ;;  %s3437_s11 = inlined_call_operand.vmem [shape: bf16[64,32], index: 11, kind: input, shape index: {}]   ;;  %s3438_s12 = inlined_call_operand.vmem [shape: f32[1,32], index: 12, kind: input, shape index: {}]   ;;  %s3439_s13 = inlined_call_operand.hbm [shape: f32[2,8,32], index: 13, kind: output, shape index: {0}]   ;;  %s3440_s14 = inlined_call_operand.hbm [shape: f32[2,4,8,8], index: 14, kind: output, shape index: {1}]  }
   0x1   :  { %3441 = sst [smem:[#allocation9_spill]] %s3426_s0 }
   0x2   :  { %3442 = sst [smem:[#allocation10_spill]] %s3427_s1 }
   0x3   :  { %3443 = sst [smem:[#allocation11_spill]] %s3428_s2 }
   0x4   :  { %3444 = sst [smem:[#allocation12_spill]] %s3429_s3 }
   0x5   :  { %3445 = sst [smem:[#allocation13_spill]] %s3430_s4 }
   0x6   :  { %3446 = sst [smem:[#allocation14_spill]] %s3431_s5 }
   0x7   :  { %3447 = sst [smem:[#allocation15_spill]] %s3432_s6 }
   0x8   :  { %20 = vsyncpa [#allocation4], 0 }
   0x9   :  { %22 = vsyncpa [#allocation4 + $0x1], 0 }
   0xa   :  { %23 = vsyncpa [#allocation6], 0 }
   0xb   :  { %25 = vsyncpa [#allocation6 + $0x1], 0  ;;  %s2945_s29 = smov 0   ;;  %s2947_s30 = smov 0  }
   0xc   :  { %s2949_s15 = smov 0   ;;  %s2951_s16 = smov 0  }
   0xd LB: > { %s2966_s17 = sadd.s32 4294967295, %s2862_s16   ;;  %s2261_s18 = sadd.s32 4294967294, %s2862_s16   ;;  %s2862_s16 = sphi %s2951_s16, %s3461_s16   ;;  %s2858_s15 = sphi %s2949_s15, %s3460_s15   ;;  %s2854_s30 = sphi %s2947_s30, %s3459_s30   ;;  %s2850_s29 = sphi %s2945_s29, %s3458_s29  }
   0xe   : > { %s2970_s19 = sadd.s32 1, %s2862_s16   ;;  %s316_s20 = sadd.s32 1, %s2858_s15 }
   0xf   : > { %s313_s21 = ssub.s32 %s2862_s16, %s2970_s19  ;;  %p326_p0 = scmp.ne.s32.totalorder %s2858_s15, %s2854_s30 }
  0x10   : > { %p314_p1 = scmp.eq.s32.totalorder %s313_s21, 0  ;;  %p327_p2 = scmp.eq.s32.totalorder %s2966_s17, 1 }
  0x11   : > { %p332_p3 = scmp.ne.s32.totalorder %s2854_s30, %s2850_s29  ;;  %p333_p4 = scmp.eq.s32.totalorder %s2261_s18, 1 }
  0x12   : > { %s2981_s22 = scalar_select %p314_p1, %s2858_s15, %s316_s20  }
  0x13   : > { %p2983_p5 = por %p327_p2, %p326_p0  ;;  %p2987_p6 = por %p333_p4, %p332_p3 }
  0x14   : > { %p2264_p7 = scmp.ge.s32.totalorder %s2862_s16, 1  ;;  %p420_p8 = scmp.lt.s32.totalorder %s2862_s16, 3 }
  0x16   : > { %p421_p9 = pnand %p2264_p7, %p420_p8 }
  0x17   : > { %p470_p10 = scmp.lt.s32.totalorder (!%p421_p9), %s2966_s17, 1  ;;  %vm478_vm0 = vcmask (!%p421_p9), 261120   ;;  %s3450_s0 = sld [smem:[#allocation9_spill]] (!%p421_p9)  ;;  %v2864_v9 = vmov (!%p421_p9), 0.0   ;;  %vm2865_vm1 = vmmov (!%p421_p9), 0   ;;  %vm707_vm2 = vcmask (!%p421_p9), 64512  }
  0x18   : > { %424 = sbr.rel (%p421_p9) target bundleno = 5251 (0x1483), region = 72  ;;  %s3451_s3 = sld [smem:[#allocation12_spill]] (!%p421_p9)  ;;  %2480 = vmatprep.subr.bf16.mxu0 (!%p421_p9), %v2864_v9  ;;  %508 = vst.msk [vmem:[#allocation2] sm:$0xff] (!%p421_p9), %vm478_vm0, %v2864_v9  ;;  %2488 = vmatprep.subr.bf16.mxu1 (!%p421_p9), %v2864_v9  ;;  %vm772_vm3 = vcmask (!%p421_p9), 1043456   ;;  %vm2089_vm4 = vcmask (!%p421_p9), 523264  }
  0x19   : > { %2484 = vmatprep.mubr.msk.bf16.mxu0 (!%p421_p9), %vm2865_vm1, %v2864_v9  ;;  %2492 = vmatprep.mubr.msk.bf16.mxu1 (!%p421_p9), %vm2865_vm1, %v2864_v9  ;;  %s3452_s1 = sld [smem:[#allocation10_spill]] (!%p421_p9)  ;;  %s3453_s2 = sld [smem:[#allocation11_spill]] (!%p421_p9) }
  0x1a   : > { %s3454_s4 = sld [smem:[#allocation13_spill]] (!%p421_p9)  ;;  %s3455_s5 = sld [smem:[#allocation14_spill]] (!%p421_p9) }
  0x1b   : > { %s3456_s6 = sld [smem:[#allocation15_spill]] (!%p421_p9)  ;;  %s2866_s28 = smov (!%p421_p9), [#allocation5]  }
  0x1e   : > { %v2716_v7 = vld [vmem:[%s3451_s3] sm:$0xff] (!%p421_p9)   ;;  %v2718_v10 = vld [vmem:[%s3451_s3 + $0x8] sm:$0xff] (!%p421_p9)   ;;  %v2722_v63 = vld [vmem:[%s3451_s3 + $0x10] sm:$0xff] (!%p421_p9)  }
  0x1f   : > { %s471_s25 = scalar_select %p470_p10, %s2966_s17, 1  ;;  %v2717_v8 = vld [vmem:[%s3451_s3 + $0x40] sm:$0xff]   ;;  %2481 = vmatpush3.bf16.msra.mxu0 %v2716_v7  ;;  %v2719_v11 = vld [vmem:[%s3451_s3 + $0x48] sm:$0xff]  }
  0x20   : > { %2489 = vmatpush3.bf16.msra.mxu1 %v2717_v8  ;;  %2482 = vmatprep.subr.bf16.mxu0 %v2864_v9  ;;  %v2268_v16 = vld [vmem:[%s3452_s1] ss:$0 sm:$0xff]  ;;  %v2721_v23 = vld [vmem:[%s3451_s3 + $0x88] sm:$0xff]   ;;  %v2279_v24 = vld [vmem:[%s3454_s4 + $0x4] ss:$0 sm:$0xff] }
  0x21   : > { %s2267_s26 = sshll.u32 %s471_s25, 3  ;;  %2490 = vmatprep.subr.bf16.mxu1 %v2864_v9  ;;  %v2269_v18 = vld [vmem:[%s3453_s2] ss:$0 sm:$0xff]  ;;  %v2288_v37 = vld [vmem:[%s3454_s4 + $0x8] ss:$0 sm:$0xff]  ;;  %s2411_s2 = sshll.u32 %s2966_s17, 9 }
  0x22   : > { %s473_s18 = scalar_lea.vmem %s3450_s0, %s2267_s26  ;;  %v2720_v21 = vld [vmem:[%s3451_s3 + $0x80] sm:$0xff]   ;;  %s3080_s26 = sand.u32 1, %s2854_s30  }
  0x23   : > { %v2998_v0 = vld [vmem:[%s473_s18] sm:$0xff]  ;;  %2483 = vmatpush3.bf16.msra.mxu0 %v2718_v10  ;;  %s2266_s27 = sshll.u32 %s3080_s26, 5  ;;  %s3347_s21 = scalar_lea.hbm %s3440_s14, %s2411_s2 }
  0x24   : > { %v479_v1 = vsel %vm478_vm0, %v2998_v0, 0.0  ;;  %2491 = vmatpush3.bf16.msra.mxu1 %v2719_v11  ;;  %2496 = vmatprep.subr.bf16.mxu0 %v2864_v9  ;;  %v2270_v35 = vld [vmem:[%s3454_s4] ss:$0 sm:$0xff]  ;;  %s3086_s20 = scalar_lea.vmem [#allocation5], %s2266_s27 }
  0x25   : > { %480 = vadd.xlane.f32.xlu0 %v479_v1  ;;  %2504 = vmatprep.subr.bf16.mxu1 %v2864_v9  ;;  %v818_v58 = vld [vmem:[%s3455_s5] sm:$0xf]  ;;  %s2167_s1 = sshll.u32 %s3086_s20, 4  ;;  %s3342_s1 = int_to_ptr.vmem [resolvable:$true] %s2167_s1 }
  0x26   : > { %v823_v59 = vsel %vm772_vm3, %v818_v58, 0  ;;  %s2768_s0 = scalar_lea.vmem %s3342_s1, 512 }
  0x27   : > { %p2769_p11 = scmp.ne.s32.totalorder %s3342_s1, %s2768_s0 }
  0x29   : > { %p2770_p12 = pnand %p2769_p11, %p2983_p5 }
  0x2b   : > { %p2771_p13 = pneg %p2770_p12 }
  0xb2   : > { %v481_v2 = vpop.xlane.xlu0 %480 }
  0xb3   : > { %v483_v3 = vmul.f32 0.03125, %v481_v2  ;;  %v2723_v2 = vld [vmem:[%s3451_s3 + $0x18] sm:$0xff]  }
  0xb5   : > { %v484_v4 = vsub.f32 %v2998_v0, %v483_v3  ;;  %v2724_v3 = vld [vmem:[%s3451_s3 + $0x90] sm:$0xff]  }
  0xb7   : > { %v485_v5 = vmul.f32 %v484_v4, %v484_v4 }
  0xb9   : > { %v486_v6 = vsel %vm478_vm0, %v485_v5, 0.0 }
  0xba   : > { %487 = vadd.xlane.f32.xlu0 %v486_v6  ;;  %v2726_v6 = vld [vmem:[%s3451_s3 + $0x50] sm:$0xff]  }
 0x147   : > { %v488_v12 = vpop.xlane.xlu0 %487 }
 0x148   : > { %v489_v13 = vmul.f32 0.03125, %v488_v12  ;;  %v2727_v12 = vld [vmem:[%s3451_s3 + $0x58] sm:$0xff]  }
 0x14a   : > { %v490_v14 = vadd.f32 1e-05, %v489_v13 }
 0x14c   : > { %2746 = vrsqrt.f32 %v490_v14 }
 0x156   : > { %v2747_v15 = vpop.eup %2746 }
 0x157   : > { %v492_v17 = vmul.f32 %v2747_v15, %v484_v4  ;;  %v2725_v4 = vld [vmem:[%s3451_s3 + $0x98] sm:$0xff]  }
 0x159   : > { %v499_v19 = vmul.f32 %v2268_v16, %v492_v17  ;;  %v2318_v17 = vld [vmem:[%s3454_s4 + $0x9] ss:$0 sm:$0xff] }
 0x15b   : > { %v506_v20 = vadd.f32 %v2269_v18, %v499_v19 }
 0x15d   : > { %v3037_v22 = vpack.c.bf16 %v506_v20, %v506_v20 }
 0x15f   : > { %2485 = vmatmul.mubr.msk.bf16.vlgmr.msra.gmra.mrb[0].mxu0 %vm478_vm0, %v3037_v22  ;;  %2493 = vmatmul.mubr.msk.bf16.vlgmr.msra.gmra.mrb[0].mxu1 %vm478_vm0, %v3037_v22 }
 0x160   : > { %2497 = vmatpush3.bf16.msra.mxu0 %v2720_v21  ;;  %2500 = vmatprep.mubr.msk.bf16.mxu0 %vm2865_vm1, %v2864_v9 }
 0x161   : > { %2498 = vmatprep.subr.bf16.mxu0 %v2864_v9  ;;  %2506 = vmatprep.mubr.msk.bf16.mxu1 %vm2865_vm1, %v2864_v9 }
 0x164   : > { %2499 = vmatpush3.bf16.msra.mxu0 %v2721_v23 }
 0x165   : > { %2510 = vmatprep.subr.bf16.mxu0 %v2864_v9 }
 0x167   : > { %2501 = vmatmul.mubr.msk.bf16.vlgmr.msra.gmra.mrb[4].mxu0 %vm478_vm0, %v3037_v22 }
 0x168   : > { %2512 = vmatprep.mubr.msk.bf16.mxu0 %vm2865_vm1, %v2864_v9 }
 0x232   : > { %v569_v25 = vpop.f32.mrb[0].mxu0  ;;  %v634_v26 = vpop.f32.mrb[0].mxu1 }
 0x233   : > { %v635_v27 = vadd.f32 %v2279_v24, %v634_v26  ;;  %v2486_v28 = vpop.f32.mrb[1].mxu0  ;;  %v2494_v29 = vpop.f32.mrb[1].mxu1  ;;  %v570_v38 = vadd.f32 %v2270_v35, %v569_v25  ;;  %v816_v26 = vld [vmem:[#allocation2] sm:$0xff] }
 0x234   : > { %v572_v30 = vpop.f32.mrb[2].mxu0  ;;  %v637_v31 = vpop.f32.mrb[2].mxu1 }
 0x235   : > { %v706_v32 = vpack.c.bf16 %v635_v27, %v635_v27  ;;  %v2487_v33 = vpop.f32.mrb[3].mxu0  ;;  %v2495_v34 = vpop.f32.mrb[3].mxu1  ;;  %v705_v43 = vpack.c.bf16 %v570_v38, %v570_v38 }
 0x237   : > { %v712_v36 = vsel %vm707_vm2, %v706_v32, 0  ;;  %v2309_v32 = vld [vmem:[%s3454_s4 + $0x5] ss:$0 sm:$0xff] }
 0x238   : > { %2505 = vmatpush3.bf16.xpose.msra.mxu1 %v712_v36 }
 0x239   : > { %2516 = vmatprep.subr.bf16.mxu1 %v2864_v9 }
 0x23a   : > { %v699_v39 = vpop.f32.mrb[4].mxu0 }
 0x23b   : > { %v700_v40 = vadd.f32 %v2288_v37, %v699_v39  ;;  %v2502_v41 = vpop.f32.mrb[5].mxu0  ;;  %v2300_v39 = vld [vmem:[%s3454_s4 + $0x1] ss:$0 sm:$0xff] }
 0x23c   : > { %v702_v42 = vpop.f32.mrb[6].mxu0 }
 0x23d   : > { %v768_v44 = vpack.c.bf16 %v700_v40, %v700_v40  ;;  %v2503_v45 = vpop.f32.mrb[7].mxu0 }
 0x23f   : > { %v774_v46 = vsel %vm772_vm3, %v768_v44, 0  ;;  %2507 = vmatmul.mubr.msk.bf16.vlgmr.msra.gmra.mrb[4].mxu1 %vm707_vm2, %v705_v43 }
 0x240   : > { %2511 = vmatpush3.bf16.msra.mxu0 %v774_v46  ;;  %2518 = vmatprep.mubr.msk.bf16.mxu1 %vm2865_vm1, %v2864_v9 }
 0x241   : > { %2522 = vmatprep.subr.bf16.mxu0 %v2864_v9  ;;  %2517 = vmatpush3.bf16.msra.mxu1 %v823_v59  ;;  %v2728_v59 = vld [vmem:[%s3451_s3 + $0x20] sm:$0xff]  }
 0x242   : > { %2530 = vmatprep.subr.bf16.mxu1 %v2864_v9 }
 0x312   : > { %v748_v47 = vpop.f32.mrb[4].mxu1 }
 0x313   : > { %v754_v48 = vmul.f32 0.35355338, %v748_v47  ;;  %v2508_v49 = vpop.f32.mrb[5].mxu1 }
 0x314   : > { %v751_v50 = vpop.f32.mrb[6].mxu1 }
 0x315   : > { %v2509_v51 = vpop.f32.mrb[7].mxu1  ;;  %v755_v52 = vsel %vm707_vm2, %v754_v48, -inf }
 0x316   : > { %756 = vmax.xlane.f32.xlu1 %v755_v52 }
 0x3a3   : > { %v757_v53 = vpop.xlane.xlu1 %756 }
 0x3a4   : > { %v758_v54 = vsub.f32 %v754_v48, %v757_v53 }
 0x3a6   : > { %v759_v55 = vmul.f32 1.442695, %v758_v54  ;;  %v2325_v54 = vld [vmem:[%s3455_s5 + $0x4] sm:$0xf] }
 0x3a8   : > { %2748 = vpow2.f32 %v759_v55  ;;  %v1180_v55 = vsel %vm772_vm3, %v2325_v54, 0 }
 0x3b2   : > { %v2749_v56 = vpop.eup %2748 }
 0x3b3   : > { %v761_v57 = vsel %vm707_vm2, %v2749_v56, 0.0 }
 0x3b4   : > { %762 = vadd.xlane.f32.xlu1 %v761_v57 }
 0x441   : > { %v763_v60 = vpop.xlane.xlu1 %762 }
 0x442   : > { %2750 = vrcp.f32 %v763_v60 }
 0x44c   : > { %v2751_v61 = vpop.eup %2750 }
 0x44d   : > { %v765_v62 = vmul.f32 %v2751_v61, %v2749_v56  ;;  %v2729_v61 = vld [vmem:[%s3451_s3 + $0x28] sm:$0xff]  }
 0x44f   : > { %v767_v1 = vpack.c.bf16 %v765_v62, %v765_v62  ;;  %766 = vst.msk [vmem:[%s3086_s20] sm:$0xff] %vm707_vm2, %v765_v62  ;;  %v2730_v62 = vld [vmem:[%s3451_s3 + $0xa0] sm:$0xff]  }
 0x451   : > { %2513 = vmatmul.mubr.msk.bf16.vlgmr.msra.gmra.mrb[8].mxu0 %vm707_vm2, %v767_v1 }
 0x452   : > { %2523 = vmatpush3.bf16.msra.mxu0 %v2722_v63  ;;  %2526 = vmatprep.mubr.msk.bf16.mxu0 %vm2865_vm1, %v2864_v9  ;;  %v2731_v63 = vld [vmem:[%s3451_s3 + $0xa8] sm:$0xff]  }
 0x453   : > { %2524 = vmatprep.subr.bf16.mxu0 %v2864_v9 }
 0x456   : > { %2525 = vmatpush3.bf16.msra.mxu0 %v2723_v2  ;;  %v2732_v2 = vld [vmem:[%s3451_s3 + $0x60] sm:$0xff]  }
 0x457   : > { %2538 = vmatprep.subr.bf16.mxu0 %v2864_v9 }
 0x459   : > { %2527 = vmatmul.mubr.msk.bf16.vlgmr.msra.gmra.mrb[12].mxu0 %vm478_vm0, %v3037_v22 }
 0x45a   : > { %2539 = vmatpush3.bf16.msra.mxu0 %v2724_v3  ;;  %2542 = vmatprep.mubr.msk.bf16.mxu0 %vm2865_vm1, %v2864_v9 }
 0x45b   : > { %2540 = vmatprep.subr.bf16.mxu0 %v2864_v9 }
 0x45e   : > { %2541 = vmatpush3.bf16.msra.mxu0 %v2725_v4 }
 0x45f   : > { %2552 = vmatprep.subr.bf16.mxu0 %v2864_v9 }
 0x461   : > { %2543 = vmatmul.mubr.msk.bf16.vlgmr.msra.gmra.mrb[16].mxu0 %vm478_vm0, %v3037_v22 }
 0x462   : > { %2554 = vmatprep.mubr.msk.bf16.mxu0 %vm2865_vm1, %v2864_v9 }
 0x524   : > { %v810_v5 = vpop.f32.mrb[8].mxu0 }
 0x525   : > { %v817_v7 = vpack.c.bf16 %v810_v5, %v810_v5  ;;  %v2514_v8 = vpop.f32.mrb[9].mxu0 }
 0x526   : > { %v813_v10 = vpop.f32.mrb[10].mxu0 }
 0x527   : > { %v2515_v11 = vpop.f32.mrb[11].mxu0  ;;  %2519 = vmatmul.mubr.msk.bf16.vlgmr.msra.gmra.mrb[8].mxu1 %vm707_vm2, %v817_v7  ;;  %v2733_v7 = vld [vmem:[%s3451_s3 + $0x68] sm:$0xff]  }
 0x528   : > { %2531 = vmatpush3.bf16.msra.mxu1 %v2726_v6  ;;  %2534 = vmatprep.mubr.msk.bf16.mxu1 %vm2865_vm1, %v2864_v9 }
 0x529   : > { %2532 = vmatprep.subr.bf16.mxu1 %v2864_v9 }
 0x52c   : > { %v926_v13 = vpop.f32.mrb[12].mxu0  ;;  %2533 = vmatpush3.bf16.msra.mxu1 %v2727_v12 }
 0x52d   : > { %v2528_v14 = vpop.f32.mrb[13].mxu0  ;;  %2546 = vmatprep.subr.bf16.mxu1 %v2864_v9  ;;  %v927_v41 = vadd.f32 %v2300_v39, %v926_v13  ;;  %v2350_v13 = vld [vmem:[%s3454_s4 + $0xa] ss:$0 sm:$0xff] }
 0x52e   : > { %v929_v15 = vpop.f32.mrb[14].mxu0 }
 0x52f   : > { %v2529_v16 = vpop.f32.mrb[15].mxu0  ;;  %2535 = vmatmul.mubr.msk.bf16.vlgmr.msra.gmra.mrb[12].mxu1 %vm478_vm0, %v3037_v22  ;;  %v1062_v42 = vpack.c.bf16 %v927_v41, %v927_v41 }
 0x530   : > { %2548 = vmatprep.mubr.msk.bf16.mxu1 %vm2865_vm1, %v2864_v9 }
 0x534   : > { %v1056_v18 = vpop.f32.mrb[16].mxu0 }
 0x535   : > { %v1057_v19 = vadd.f32 %v2318_v17, %v1056_v18  ;;  %v2544_v20 = vpop.f32.mrb[17].mxu0 }
 0x536   : > { %v1059_v21 = vpop.f32.mrb[18].mxu0 }
 0x537   : > { %v1125_v23 = vpack.c.bf16 %v1057_v19, %v1057_v19  ;;  %v2545_v24 = vpop.f32.mrb[19].mxu0 }
 0x539   : > { %v1130_v25 = vsel %vm772_vm3, %v1125_v23, 0 }
 0x53a   : > { %2553 = vmatpush3.bf16.msra.mxu0 %v1130_v25 }
 0x53b   : > { %2564 = vmatprep.subr.bf16.mxu0 %v2864_v9 }
 0x5fa   : > { %v859_v27 = vpop.f32.mrb[8].mxu1 }
 0x5fb   : > { %v865_v28 = vadd.f32 %v859_v27, %v816_v26  ;;  %v2520_v29 = vpop.f32.mrb[9].mxu1 }
 0x5fc   : > { %v862_v30 = vpop.f32.mrb[10].mxu1 }
 0x5fd   : > { %866 = vst.msk [vmem:[#allocation2] sm:$0xff] %vm478_vm0, %v865_v28  ;;  %v2521_v31 = vpop.f32.mrb[11].mxu1  ;;  %v2341_v28 = vld [vmem:[%s3454_s4 + $0x6] ss:$0 sm:$0xff] }
 0x602   : > { %v991_v33 = vpop.f32.mrb[12].mxu1 }
 0x603   : > { %v992_v34 = vadd.f32 %v2309_v32, %v991_v33  ;;  %v2536_v35 = vpop.f32.mrb[13].mxu1 }
 0x604   : > { %v994_v36 = vpop.f32.mrb[14].mxu1  ;;  %v1172_v21 = vld [vmem:[#allocation2] sm:$0xff] }
 0x605   : > { %v1063_v37 = vpack.c.bf16 %v992_v34, %v992_v34  ;;  %v2537_v38 = vpop.f32.mrb[15].mxu1  ;;  %v2332_v35 = vld [vmem:[%s3454_s4 + $0x2] ss:$0 sm:$0xff] }
 0x607   : > { %v1068_v40 = vsel %vm707_vm2, %v1063_v37, 0 }
 0x608   : > { %2547 = vmatpush3.bf16.xpose.msra.mxu1 %v1068_v40 }
 0x609   : > { %2558 = vmatprep.subr.bf16.mxu1 %v2864_v9 }
 0x60f   : > { %2549 = vmatmul.mubr.msk.bf16.vlgmr.msra.gmra.mrb[16].mxu1 %vm707_vm2, %v1062_v42 }
 0x610   : > { %2560 = vmatprep.mubr.msk.bf16.mxu1 %vm2865_vm1, %v2864_v9  ;;  %2559 = vmatpush3.bf16.msra.mxu1 %v1180_v55  ;;  %v2734_v55 = vld [vmem:[%s3451_s3 + $0x30] sm:$0xff]  }
 0x611   : > { %2572 = vmatprep.subr.bf16.mxu1 %v2864_v9 }
 0x6e2   : > { %v1104_v43 = vpop.f32.mrb[16].mxu1 }
 0x6e3   : > { %v1110_v44 = vmul.f32 0.35355338, %v1104_v43  ;;  %v2550_v45 = vpop.f32.mrb[17].mxu1 }
 0x6e4   : > { %v1107_v46 = vpop.f32.mrb[18].mxu1 }
 0x6e5   : > { %v2551_v47 = vpop.f32.mrb[19].mxu1  ;;  %v1111_v48 = vsel %vm707_vm2, %v1110_v44, -inf }
 0x6e6   : > { %1112 = vmax.xlane.f32.xlu0 %v1111_v48 }
 0x773   : > { %v1113_v49 = vpop.xlane.xlu0 %1112 }
 0x774   : > { %v1114_v50 = vsub.f32 %v1110_v44, %v1113_v49 }
 0x776   : > { %v1115_v51 = vmul.f32 1.442695, %v1114_v50  ;;  %v2357_v50 = vld [vmem:[%s3455_s5 + $0x8] sm:$0xf] }
 0x778   : > { %2752 = vpow2.f32 %v1115_v51  ;;  %v1537_v51 = vsel %vm772_vm3, %v2357_v50, 0 }
 0x782   : > { %v2753_v52 = vpop.eup %2752 }
 0x783   : > { %v1117_v53 = vsel %vm707_vm2, %v2753_v52, 0.0 }
 0x784   : > { %1118 = vadd.xlane.f32.xlu1 %v1117_v53 }
 0x811   : > { %v1119_v56 = vpop.xlane.xlu1 %1118 }
 0x812   : > { %2754 = vrcp.f32 %v1119_v56 }
 0x81c   : > { %v2755_v57 = vpop.eup %2754 }
 0x81d   : > { %v1121_v58 = vmul.f32 %v2755_v57, %v2753_v52  ;;  %v2735_v57 = vld [vmem:[%s3451_s3 + $0x38] sm:$0xff]  }
 0x81f   : > { %v1124_v60 = vpack.c.bf16 %v1121_v58, %v1121_v58  ;;  %2323 = vst.msk [vmem:[%s3086_s20 + $0x8] sm:$0xff] %vm707_vm2, %v1121_v58  ;;  %v2736_v58 = vld [vmem:[%s3451_s3 + $0xb0] sm:$0xff]  }
 0x821   : > { %2555 = vmatmul.mubr.msk.bf16.vlgmr.msra.gmra.mrb[20].mxu0 %vm707_vm2, %v1124_v60 }
 0x822   : > { %2565 = vmatpush3.bf16.msra.mxu0 %v2728_v59  ;;  %2568 = vmatprep.mubr.msk.bf16.mxu0 %vm2865_vm1, %v2864_v9  ;;  %v2737_v59 = vld [vmem:[%s3451_s3 + $0xb8] sm:$0xff]  }
 0x823   : > { %2566 = vmatprep.subr.bf16.mxu0 %v2864_v9 }
 0x826   : > { %2567 = vmatpush3.bf16.msra.mxu0 %v2729_v61  ;;  %v2738_v61 = vld [vmem:[%s3451_s3 + $0x70] sm:$0xff]  }
 0x827   : > { %2580 = vmatprep.subr.bf16.mxu0 %v2864_v9 }
 0x829   : > { %2569 = vmatmul.mubr.msk.bf16.vlgmr.msra.gmra.mrb[24].mxu0 %vm478_vm0, %v3037_v22 }
 0x82a   : > { %2581 = vmatpush3.bf16.msra.mxu0 %v2730_v62  ;;  %2584 = vmatprep.mubr.msk.bf16.mxu0 %vm2865_vm1, %v2864_v9 }
 0x82b   : > { %2582 = vmatprep.subr.bf16.mxu0 %v2864_v9 }
 0x82e   : > { %2583 = vmatpush3.bf16.msra.mxu0 %v2731_v63 }
 0x82f   : > { %2594 = vmatprep.subr.bf16.mxu0 %v2864_v9 }
 0x831   : > { %2585 = vmatmul.mubr.msk.bf16.vlgmr.msra.gmra.mrb[28].mxu0 %vm478_vm0, %v3037_v22 }
 0x832   : > { %2596 = vmatprep.mubr.msk.bf16.mxu0 %vm2865_vm1, %v2864_v9 }
 0x8f4   : > { %v1166_v1 = vpop.f32.mrb[20].mxu0 }
 0x8f5   : > { %v1173_v3 = vpack.c.bf16 %v1166_v1, %v1166_v1  ;;  %v2556_v4 = vpop.f32.mrb[21].mxu0 }
 0x8f6   : > { %v1169_v5 = vpop.f32.mrb[22].mxu0 }
 0x8f7   : > { %v2557_v6 = vpop.f32.mrb[23].mxu0  ;;  %2561 = vmatmul.mubr.msk.bf16.vlgmr.msra.gmra.mrb[20].mxu1 %vm707_vm2, %v1173_v3  ;;  %v2739_v3 = vld [vmem:[%s3451_s3 + $0x78] sm:$0xff]   ;;  %s2772_s3 = sshll.u32 %s2866_s28, 4  ;;  %s2773_s3 = int_to_ptr.vmem [resolvable:$false] %s2772_s3 }
 0x8f8   : > { %2573 = vmatpush3.bf16.msra.mxu1 %v2732_v2  ;;  %2576 = vmatprep.mubr.msk.bf16.mxu1 %vm2865_vm1, %v2864_v9  ;;  %p2775_p0 = scmp.lt.s32.totalorder %s3342_s1, %s2773_s3 }
 0x8f9   : > { %2574 = vmatprep.subr.bf16.mxu1 %v2864_v9 }
 0x8fc   : > { %v1283_v8 = vpop.f32.mrb[24].mxu0  ;;  %2575 = vmatpush3.bf16.msra.mxu1 %v2733_v7 }
 0x8fd   : > { %v2570_v10 = vpop.f32.mrb[25].mxu0  ;;  %2588 = vmatprep.subr.bf16.mxu1 %v2864_v9  ;;  %v1284_v37 = vadd.f32 %v2332_v35, %v1283_v8  ;;  %v2382_v8 = vld [vmem:[%s3454_s4 + $0xb] ss:$0 sm:$0xff] }
 0x8fe   : > { %v1286_v11 = vpop.f32.mrb[26].mxu0 }
 0x8ff   : > { %v2571_v12 = vpop.f32.mrb[27].mxu0  ;;  %2577 = vmatmul.mubr.msk.bf16.vlgmr.msra.gmra.mrb[24].mxu1 %vm478_vm0, %v3037_v22  ;;  %v1419_v38 = vpack.c.bf16 %v1284_v37, %v1284_v37 }
 0x900   : > { %2590 = vmatprep.mubr.msk.bf16.mxu1 %vm2865_vm1, %v2864_v9 }
 0x904   : > { %v1413_v14 = vpop.f32.mrb[28].mxu0 }
 0x905   : > { %v1414_v15 = vadd.f32 %v2350_v13, %v1413_v14  ;;  %v2586_v16 = vpop.f32.mrb[29].mxu0 }
 0x906   : > { %v1416_v17 = vpop.f32.mrb[30].mxu0 }
 0x907   : > { %v1482_v18 = vpack.c.bf16 %v1414_v15, %v1414_v15  ;;  %v2587_v19 = vpop.f32.mrb[31].mxu0 }
 0x909   : > { %v1487_v20 = vsel %vm772_vm3, %v1482_v18, 0 }
 0x90a   : > { %2595 = vmatpush3.bf16.msra.mxu0 %v1487_v20 }
 0x90b   : > { %2606 = vmatprep.subr.bf16.mxu0 %v2864_v9 }
 0x9ca   : > { %v1216_v23 = vpop.f32.mrb[20].mxu1 }
 0x9cb   : > { %v1222_v24 = vadd.f32 %v1216_v23, %v1172_v21  ;;  %v2562_v25 = vpop.f32.mrb[21].mxu1  ;;  %v2373_v23 = vld [vmem:[%s3454_s4 + $0x7] ss:$0 sm:$0xff] }
 0x9cc   : > { %v1219_v26 = vpop.f32.mrb[22].mxu1 }
 0x9cd   : > { %1223 = vst.msk [vmem:[#allocation2] sm:$0xff] %vm478_vm0, %v1222_v24  ;;  %v2563_v27 = vpop.f32.mrb[23].mxu1 }
 0x9d2   : > { %v1348_v29 = vpop.f32.mrb[24].mxu1 }
 0x9d3   : > { %v1349_v30 = vadd.f32 %v2341_v28, %v1348_v29  ;;  %v2578_v31 = vpop.f32.mrb[25].mxu1 }
 0x9d4   : > { %v1351_v32 = vpop.f32.mrb[26].mxu1  ;;  %v1529_v17 = vld [vmem:[#allocation2] sm:$0xff] }
 0x9d5   : > { %v1420_v33 = vpack.c.bf16 %v1349_v30, %v1349_v30  ;;  %v2579_v34 = vpop.f32.mrb[27].mxu1  ;;  %v2364_v30 = vld [vmem:[%s3454_s4 + $0x3] ss:$0 sm:$0xff] }
 0x9d7   : > { %v1425_v36 = vsel %vm707_vm2, %v1420_v33, 0 }
 0x9d8   : > { %2589 = vmatpush3.bf16.xpose.msra.mxu1 %v1425_v36 }
 0x9d9   : > { %2600 = vmatprep.subr.bf16.mxu1 %v2864_v9 }
 0x9df   : > { %2591 = vmatmul.mubr.msk.bf16.vlgmr.msra.gmra.mrb[28].mxu1 %vm707_vm2, %v1419_v38 }
 0x9e0   : > { %2602 = vmatprep.mubr.msk.bf16.mxu1 %vm2865_vm1, %v2864_v9  ;;  %2601 = vmatpush3.bf16.msra.mxu1 %v1537_v51 }
 0x9e1   : > { %2614 = vmatprep.subr.bf16.mxu1 %v2864_v9 }
 0xab2   : > { %v1461_v39 = vpop.f32.mrb[28].mxu1 }
 0xab3   : > { %v1467_v40 = vmul.f32 0.35355338, %v1461_v39  ;;  %v2592_v41 = vpop.f32.mrb[29].mxu1 }
 0xab4   : > { %v1464_v42 = vpop.f32.mrb[30].mxu1 }
 0xab5   : > { %v2593_v43 = vpop.f32.mrb[31].mxu1  ;;  %v1468_v44 = vsel %vm707_vm2, %v1467_v40, -inf }
 0xab6   : > { %1469 = vmax.xlane.f32.xlu0 %v1468_v44 }
 0xb43   : > { %v1470_v45 = vpop.xlane.xlu0 %1469 }
 0xb44   : > { %v1471_v46 = vsub.f32 %v1467_v40, %v1470_v45  ;;  %v2389_v45 = vld [vmem:[%s3455_s5 + $0xc] sm:$0xf] }
 0xb46   : > { %v1472_v47 = vmul.f32 1.442695, %v1471_v46  ;;  %v1894_v46 = vsel %vm772_vm3, %v2389_v45, 0 }
 0xb48   : > { %2756 = vpow2.f32 %v1472_v47 }
 0xb52   : > { %v2757_v48 = vpop.eup %2756 }
 0xb53   : > { %v1474_v49 = vsel %vm707_vm2, %v2757_v48, 0.0 }
 0xb54   : > { %1475 = vadd.xlane.f32.xlu1 %v1474_v49 }
 0xbe1   : > { %v1476_v52 = vpop.xlane.xlu1 %1475 }
 0xbe2   : > { %2758 = vrcp.f32 %v1476_v52 }
 0xbec   : > { %v2759_v53 = vpop.eup %2758 }
 0xbed   : > { %v1478_v54 = vmul.f32 %v2759_v53, %v2757_v48 }
 0xbef   : > { %v1481_v56 = vpack.c.bf16 %v1478_v54, %v1478_v54  ;;  %2355 = vst.msk [vmem:[%s3086_s20 + $0x10] sm:$0xff] %vm707_vm2, %v1478_v54 }
 0xbf1   : > { %2597 = vmatmul.mubr.msk.bf16.vlgmr.msra.gmra.mrb[32].mxu0 %vm707_vm2, %v1481_v56 }
 0xbf2   : > { %2607 = vmatpush3.bf16.msra.mxu0 %v2734_v55  ;;  %2610 = vmatprep.mubr.msk.bf16.mxu0 %vm2865_vm1, %v2864_v9 }
 0xbf3   : > { %2608 = vmatprep.subr.bf16.mxu0 %v2864_v9 }
 0xbf6   : > { %2609 = vmatpush3.bf16.msra.mxu0 %v2735_v57 }
 0xbf7   : > { %2622 = vmatprep.subr.bf16.mxu0 %v2864_v9 }
 0xbf9   : > { %2611 = vmatmul.mubr.msk.bf16.vlgmr.msra.gmra.mrb[36].mxu0 %vm478_vm0, %v3037_v22 }
 0xbfa   : > { %2623 = vmatpush3.bf16.msra.mxu0 %v2736_v58  ;;  %2626 = vmatprep.mubr.msk.bf16.mxu0 %vm2865_vm1, %v2864_v9 }
 0xbfb   : > { %2624 = vmatprep.subr.bf16.mxu0 %v2864_v9 }
 0xbfe   : > { %2625 = vmatpush3.bf16.msra.mxu0 %v2737_v59 }
 0xbff   : > { %2636 = vmatprep.subr.bf16.mxu0 %v2864_v9 }
 0xc01   : > { %2627 = vmatmul.mubr.msk.bf16.vlgmr.msra.gmra.mrb[40].mxu0 %vm478_vm0, %v3037_v22 }
 0xc02   : > { %2638 = vmatprep.mubr.msk.bf16.mxu0 %vm2865_vm1, %v2864_v9 }
 0xcc4   : > { %v1523_v60 = vpop.f32.mrb[32].mxu0 }
 0xcc5   : > { %v1530_v62 = vpack.c.bf16 %v1523_v60, %v1523_v60  ;;  %v2598_v63 = vpop.f32.mrb[33].mxu0 }
 0xcc6   : > { %v1526_v1 = vpop.f32.mrb[34].mxu0  ;;  %v2391_v63 = vld [vmem:[%s3456_s6] ss:$0 sm:$0xff] }
 0xcc7   : > { %v2599_v2 = vpop.f32.mrb[35].mxu0  ;;  %2603 = vmatmul.mubr.msk.bf16.vlgmr.msra.gmra.mrb[32].mxu1 %vm707_vm2, %v1530_v62 }
 0xcc8   : > { %2615 = vmatpush3.bf16.msra.mxu1 %v2738_v61  ;;  %2618 = vmatprep.mubr.msk.bf16.mxu1 %vm2865_vm1, %v2864_v9 }
 0xcc9   : > { %2616 = vmatprep.subr.bf16.mxu1 %v2864_v9 }
 0xccc   : > { %v1640_v4 = vpop.f32.mrb[36].mxu0  ;;  %2617 = vmatpush3.bf16.msra.mxu1 %v2739_v3 }
 0xccd   : > { %v2612_v5 = vpop.f32.mrb[37].mxu0  ;;  %2630 = vmatprep.subr.bf16.mxu1 %v2864_v9  ;;  %v1641_v32 = vadd.f32 %v2364_v30, %v1640_v4 }
 0xcce   : > { %v1643_v6 = vpop.f32.mrb[38].mxu0 }
 0xccf   : > { %v2613_v7 = vpop.f32.mrb[39].mxu0  ;;  %2619 = vmatmul.mubr.msk.bf16.vlgmr.msra.gmra.mrb[36].mxu1 %vm478_vm0, %v3037_v22  ;;  %v1776_v33 = vpack.c.bf16 %v1641_v32, %v1641_v32 }
 0xcd0   : > { %2632 = vmatprep.mubr.msk.bf16.mxu1 %vm2865_vm1, %v2864_v9 }
 0xcd4   : > { %v1770_v10 = vpop.f32.mrb[40].mxu0 }
 0xcd5   : > { %v1771_v11 = vadd.f32 %v2382_v8, %v1770_v10  ;;  %v2628_v12 = vpop.f32.mrb[41].mxu0  ;;  %v2740_v10 = vld [vmem:[%s3435_s9] sm:$0xff]  }
 0xcd6   : > { %v1773_v13 = vpop.f32.mrb[42].mxu0 }
 0xcd7   : > { %v1839_v14 = vpack.c.bf16 %v1771_v11, %v1771_v11  ;;  %v2629_v15 = vpop.f32.mrb[43].mxu0 }
 0xcd8   : > { %v2392_v15 = vld [vmem:[%s3433_s7] ss:$0 sm:$0xff] }
 0xcd9   : > { %v1844_v16 = vsel %vm772_vm3, %v1839_v14, 0 }
 0xcda   : > { %2637 = vmatpush3.bf16.msra.mxu0 %v1844_v16 }
 0xcdb   : > { %2648 = vmatprep.subr.bf16.mxu0 %v2864_v9 }
 0xd9a   : > { %v1573_v22 = vpop.f32.mrb[32].mxu1 }
 0xd9b   : > { %v1579_v18 = vadd.f32 %v1573_v22, %v1529_v17  ;;  %v2604_v19 = vpop.f32.mrb[33].mxu1  ;;  %v2393_v17 = vld [vmem:[%s3434_s8] ss:$0 sm:$0xff] }
 0xd9c   : > { %v1576_v20 = vpop.f32.mrb[34].mxu1 }
 0xd9d   : > { %1580 = vst.msk [vmem:[#allocation2] sm:$0xff] %vm478_vm0, %v1579_v18  ;;  %v2605_v21 = vpop.f32.mrb[35].mxu1  ;;  %v2742_v20 = vld [vmem:[%s3437_s11] sm:$0xff]  }
 0xd9e   : > { %v2743_v21 = vld [vmem:[%s3437_s11 + $0x8] sm:$0xff]  }
 0xda2   : > { %v1705_v24 = vpop.f32.mrb[36].mxu1 }
 0xda3   : > { %v1706_v25 = vadd.f32 %v2373_v23, %v1705_v24  ;;  %v2620_v26 = vpop.f32.mrb[37].mxu1  ;;  %v2744_v23 = vld [vmem:[%s3437_s11 + $0x10] sm:$0xff]   ;;  %v2745_v24 = vld [vmem:[%s3437_s11 + $0x18] sm:$0xff]  }
 0xda4   : > { %v1708_v27 = vpop.f32.mrb[38].mxu1  ;;  %v1886_v56 = vld [vmem:[#allocation2] sm:$0xff] }
 0xda5   : > { %v1777_v28 = vpack.c.bf16 %v1706_v25, %v1706_v25  ;;  %v2621_v29 = vpop.f32.mrb[39].mxu1  ;;  %v2394_v25 = vld [vmem:[%s3436_s10] ss:$0 sm:$0xff] }
 0xda7   : > { %v1782_v31 = vsel %vm707_vm2, %v1777_v28, 0 }
 0xda8   : > { %2631 = vmatpush3.bf16.xpose.msra.mxu1 %v1782_v31 }
 0xda9   : > { %2642 = vmatprep.subr.bf16.mxu1 %v2864_v9 }
 0xdaf   : > { %2633 = vmatmul.mubr.msk.bf16.vlgmr.msra.gmra.mrb[40].mxu1 %vm707_vm2, %v1776_v33 }
 0xdb0   : > { %2644 = vmatprep.mubr.msk.bf16.mxu1 %vm2865_vm1, %v2864_v9  ;;  %2643 = vmatpush3.bf16.msra.mxu1 %v1894_v46 }
 0xdb1   : > { %2656 = vmatprep.subr.bf16.mxu1 %v2864_v9 }
 0xe82   : > { %v1818_v34 = vpop.f32.mrb[40].mxu1 }
 0xe83   : > { %v1824_v35 = vmul.f32 0.35355338, %v1818_v34  ;;  %v2634_v36 = vpop.f32.mrb[41].mxu1 }
 0xe84   : > { %v1821_v37 = vpop.f32.mrb[42].mxu1 }
 0xe85   : > { %v2635_v38 = vpop.f32.mrb[43].mxu1  ;;  %v1825_v39 = vsel %vm707_vm2, %v1824_v35, -inf }
 0xe86   : > { %1826 = vmax.xlane.f32.xlu0 %v1825_v39 }
 0xf13   : > { %v1827_v40 = vpop.xlane.xlu0 %1826 }
 0xf14   : > { %v1828_v41 = vsub.f32 %v1824_v35, %v1827_v40 }
 0xf16   : > { %v1829_v42 = vmul.f32 1.442695, %v1828_v41 }
 0xf18   : > { %2760 = vpow2.f32 %v1829_v42 }
 0xf22   : > { %v2761_v43 = vpop.eup %2760 }
 0xf23   : > { %v1831_v44 = vsel %vm707_vm2, %v2761_v43, 0.0 }
 0xf24   : > { %1832 = vadd.xlane.f32.xlu1 %v1831_v44 }
 0xfb1   : > { %v1833_v47 = vpop.xlane.xlu1 %1832 }
 0xfb2   : > { %2762 = vrcp.f32 %v1833_v47 }
 0xfbc   : > { %v2763_v48 = vpop.eup %2762 }
 0xfbd   : > { %v1835_v49 = vmul.f32 %v2763_v48, %v2761_v43 }
 0xfbf   : > { %v1838_v50 = vpack.c.bf16 %v1835_v49, %v1835_v49  ;;  %2387 = vst.msk [vmem:[%s3086_s20 + $0x18] sm:$0xff] %vm707_vm2, %v1835_v49  ;;  %s2774_s20 = scalar_lea.vmem %s2773_s3, 1024 }
 0xfc0   : > { %p2776_p1 = scmp.lt.s32.totalorder %s2774_s20, %s2768_s0 }
 0xfc1   : > { %2639 = vmatmul.mubr.msk.bf16.vlgmr.msra.gmra.mrb[44].mxu0 %vm707_vm2, %v1838_v50 }
 0xfc2   : > { %2652 = vmatprep.mubr.msk.bf16.mxu0 %vm2865_vm1, %v2864_v9  ;;  %2649 = vmatpush3.bf16.msra.mxu0 %v2740_v10  ;;  %p2777_p2 = por %p2776_p1, %p2775_p0 }
 0xfc3   : > { %2650 = vmatprep.subr.bf16.mxu0 %v2864_v9 }
 0xfc4   : > { %p2778_p3 = pnand %p2777_p2, %p2771_p13 }
0x1094   : > { %v1880_v51 = vpop.f32.mrb[44].mxu0 }
0x1095   : > { %v1887_v52 = vpack.c.bf16 %v1880_v51, %v1880_v51  ;;  %v2640_v53 = vpop.f32.mrb[45].mxu0 }
0x1096   : > { %v1883_v54 = vpop.f32.mrb[46].mxu0 }
0x1097   : > { %v2641_v55 = vpop.f32.mrb[47].mxu0  ;;  %2645 = vmatmul.mubr.msk.bf16.vlgmr.msra.gmra.mrb[44].mxu1 %vm707_vm2, %v1887_v52 }
0x1098   : > { %2664 = vmatprep.mubr.msk.bf16.mxu1 %vm2865_vm1, %v2864_v9  ;;  %2657 = vmatpush3.bf16.msra.mxu1 %v2742_v20 }
0x1099   : > { %2658 = vmatprep.subr.bf16.mxu1 %v2864_v9 }
0x109c   : > { %2659 = vmatpush3.bf16.msra.mxu1 %v2743_v21 }
0x109d   : > { %2660 = vmatprep.subr.bf16.mxu1 %v2864_v9 }
0x10a0   : > { %2661 = vmatpush3.bf16.msra.mxu1 %v2744_v23 }
0x10a1   : > { %2662 = vmatprep.subr.bf16.mxu1 %v2864_v9 }
0x10a4   : > { %2663 = vmatpush3.bf16.msra.mxu1 %v2745_v24 }
0x116a   : > { %v1930_v57 = vpop.f32.mrb[44].mxu1 }
0x116b   : > { %v1936_v58 = vadd.f32 %v1930_v57, %v1886_v56  ;;  %v2646_v59 = vpop.f32.mrb[45].mxu1 }
0x116c   : > { %v1933_v60 = vpop.f32.mrb[46].mxu1 }
0x116d   : > { %1937 = vst.msk [vmem:[#allocation2] sm:$0xff] %vm478_vm0, %v1936_v58  ;;  %v2647_v61 = vpop.f32.mrb[47].mxu1 }
0x1174   : > { %v1938_v62 = vld [vmem:[#allocation2] sm:$0xff] }
0x1175   : > { %v1939_v1 = vadd.f32 %v1938_v62, %v2998_v0  ;;  %v2741_v0 = vld [vmem:[%s3435_s9 + $0x8] sm:$0xff]  }
0x1176   : > { %2651 = vmatpush3.bf16.msra.mxu0 %v2741_v0 }
0x1177   : > { %v3302_v2 = vadd.f32 %v2391_v63, %v1939_v1 }
0x1179   : > { %v1950_v3 = vsel %vm478_vm0, %v3302_v2, 0.0 }
0x117a   : > { %1951 = vadd.xlane.f32.xlu0 %v1950_v3 }
0x1207   : > { %v1952_v4 = vpop.xlane.xlu0 %1951 }
0x1208   : > { %v1953_v5 = vmul.f32 0.03125, %v1952_v4 }
0x120a   : > { %v1954_v6 = vsub.f32 %v3302_v2, %v1953_v5 }
0x120c   : > { %v1955_v7 = vmul.f32 %v1954_v6, %v1954_v6 }
0x120e   : > { %v1956_v8 = vsel %vm478_vm0, %v1955_v7, 0.0 }
0x120f   : > { %1957 = vadd.xlane.f32.xlu1 %v1956_v8 }
0x129c   : > { %v1958_v11 = vpop.xlane.xlu1 %1957 }
0x129d   : > { %v1959_v12 = vmul.f32 0.03125, %v1958_v11 }
0x129f   : > { %v1960_v13 = vadd.f32 1e-05, %v1959_v12 }
0x12a1   : > { %2764 = vrsqrt.f32 %v1960_v13 }
0x12ab   : > { %v2765_v14 = vpop.eup %2764 }
0x12ac   : > { %v1962_v16 = vmul.f32 %v2765_v14, %v1954_v6 }
0x12ae   : > { %v1969_v22 = vmul.f32 %v2392_v15, %v1962_v16 }
0x12b0   : > { %v1976_v18 = vadd.f32 %v2393_v17, %v1969_v22 }
0x12b2   : > { %v1977_v19 = vpack.c.bf16 %v1976_v18, %v1976_v18 }
0x12b4   : > { %2653 = vmatmul.mubr.msk.bf16.vlgmr.msra.gmra.mrb[48].mxu0 %vm478_vm0, %v1977_v19 }
0x1387   : > { %v2038_v26 = vpop.f32.mrb[48].mxu0 }
0x1388   : > { %v2039_v27 = vadd.f32 %v2394_v25, %v2038_v26  ;;  %v2654_v28 = vpop.f32.mrb[49].mxu0 }
0x1389   : > { %v2041_v29 = vpop.f32.mrb[50].mxu0 }
0x138a   : > { %v2045_v30 = vmul.f32 0.70710677, %v2039_v27  ;;  %v2655_v31 = vpop.f32.mrb[51].mxu0  ;;  %v2044_v32 = vmul.f32 0.5, %v2039_v27 }
0x138c   : > { %2766 = verf.f32 %v2045_v30 }
0x1396   : > { %v2767_v9 = vpop.eup %2766 }
0x1397   : > { %v2047_v33 = vadd.f32 1.0, %v2767_v9 }
0x1399   : > { %v2048_v34 = vmul.f32 %v2047_v33, %v2044_v32 }
0x139b   : > { %v2049_v35 = vpack.c.bf16 %v2048_v34, %v2048_v34 }
0x139d   : > { %2665 = vmatmul.mubr.msk.bf16.vlgmr.msra.gmra.mrb[48].mxu1 %vm2089_vm4, %v2049_v35 }
0x139e   : > { %2781 = shalt.err (!%p2778_p3)
}
0x139f   : > { %s2782_s2 = scalar_lea.hbm %s3347_s21, 512  ;;  %s2786_s28 = scalar_lea.hbm %s3440_s14, 1024 }
0x13a0   : > { %p2783_p4 = scmp.ne.s32.totalorder %s3347_s21, %s2782_s2  ;;  %p2787_p9 = scmp.lt.u32.totalorder %s3347_s21, %s3440_s14 }
0x13a1   : > { %p2788_p10 = scmp.lt.u32.totalorder %s2786_s28, %s2782_s2  ;;  %p2790_p12 = scmp.lt.u32.totalorder %s2782_s2, %s3347_s21 }
0x13a2   : > { %p2784_p7 = pnand %p2783_p4, %p2983_p5 }
0x13a3   : > { %p2789_p11 = por %p2788_p10, %p2787_p9 }
0x13a4   : > { %p2785_p8 = pneg %p2784_p7 }
0x13a5   : > { %p2791_p13 = por %p2790_p12, %p2789_p11 }
0x13a7   : > { %p2792_p0 = pnand %p2791_p13, %p2785_p8 }
0x13a9   : > { %2795 = shalt.err (!%p2792_p0)
}
0x13aa   : > { %s2867_s0 = smov 128   ;;  %s2868_s20 = smov 8   ;;  %v2398_v36 = vld [vmem:[%s3438_s12] ss:$0 sm:$0xff] }
0x13ab   : > { %s3457_s18 = scalar_lea.sflag [#allocation6], %s3080_s26  ;;  %s2265_s25 = sshll.u32 %s3080_s26, 3 }
0x13ac   : > { %2669 = dma.vmem_to_hbm [thread:$0]  (%p2983_p5), %s3342_s1, 512, %s3347_s21, %s3457_s18, %s2867_s0, %s2867_s0, %s2868_s20  }
0x13ad   : > { %s2406_s2 = sshll.u32 %s2966_s17, 7  ;;  %s462_s3 = scalar_lea.vmem [#allocation3], %s2265_s25 }
0x13ae   : > { %s2154_s4 = sshll.u32 %s462_s3, 4  ;;  %s3382_s1 = scalar_lea.hbm %s3439_s13, %s2406_s2  ;;  %s3384_s4 = int_to_ptr.vmem [resolvable:$true] %s2154_s4 }
0x13af   : > { %s2136_s17 = scalar_lea.sflag [#allocation4], %s3080_s26  ;;  %s2796_s21 = scalar_lea.vmem %s3384_s4, 128 }
0x13b0   : > { %p2797_p1 = scmp.ne.s32.totalorder %s3384_s4, %s2796_s21  ;;  %s2869_s0 = smov [#allocation3]  }
0x13b1   : > { %s2800_s20 = sshll.u32 %s2869_s0, 4  ;;  %s2801_s20 = int_to_ptr.vmem [resolvable:$false] %s2800_s20 }
0x13b2   : > { %p2798_p2 = pnand %p2797_p1, %p2983_p5  ;;  %s2802_s18 = scalar_lea.vmem %s2801_s20, 256 }
0x13b3   : > { %p2803_p4 = scmp.lt.s32.totalorder %s3384_s4, %s2801_s20  ;;  %p2804_p7 = scmp.lt.s32.totalorder %s2802_s18, %s2796_s21 }
0x13b4   : > { %p2799_p3 = pneg %p2798_p2 }
0x13b5   : > { %p2805_p8 = por %p2804_p7, %p2803_p4 }
0x13b7   : > { %p2806_p9 = pnand %p2805_p8, %p2799_p3 }
0x1470   : > { %v2127_v37 = vpop.f32.mrb[48].mxu1 }
0x1471   : > { %v2128_v38 = vadd.f32 %v2398_v36, %v2127_v37  ;;  %v2666_v39 = vpop.f32.mrb[49].mxu1 }
0x1472   : > { %v2130_v40 = vpop.f32.mrb[50].mxu1 }
0x1473   : > { %v2133_v41 = vadd.f32 %v2128_v38, %v3302_v2  ;;  %v2667_v42 = vpop.f32.mrb[51].mxu1 }
0x1475   : > { %2134 = vst.msk [vmem:[%s462_s3] sm:$0xff] %vm478_vm0, %v2133_v41 }
0x1476   : > { %2809 = shalt.err (!%p2806_p9)
}
0x1477   : > { %s2810_s5 = scalar_lea.hbm %s3382_s1, 128  ;;  %s2814_s25 = scalar_lea.hbm %s3439_s13, 256 }
0x1478   : > { %p2811_p10 = scmp.ne.s32.totalorder %s3382_s1, %s2810_s5  ;;  %p2815_p13 = scmp.lt.u32.totalorder %s3382_s1, %s3439_s13 }
0x1479   : > { %p2816_p0 = scmp.lt.u32.totalorder %s2814_s25, %s2810_s5  ;;  %p2818_p2 = scmp.lt.u32.totalorder %s2810_s5, %s3382_s1 }
0x147a   : > { %p2812_p11 = pnand %p2811_p10, %p2983_p5 }
0x147b   : > { %p2817_p1 = por %p2816_p0, %p2815_p13 }
0x147c   : > { %p2813_p12 = pneg %p2812_p11 }
0x147d   : > { %p2819_p3 = por %p2818_p2, %p2817_p1 }
0x147f   : > { %p2820_p4 = pnand %p2819_p3, %p2813_p12 }
0x1481   : > { %2823 = shalt.err (!%p2820_p4)
}
0x1482   : > { %2668 = dma.vmem_to_hbm [thread:$0]  (%p2983_p5), %s3384_s4, 128, %s3382_s1, %s2136_s17  }
0x1483 PF: > { %p2679_p7 = scmp.ge.s32.totalorder %s2862_s16, 2  ;;  %s2182_s2 = sand.u32 1, %s2850_s29  }
0x1484   : > { %s2183_s3 = scalar_lea.sflag [#allocation4], %s2182_s2 }
0x1485   : > { %p2673_p8 = pnand %p2679_p7, %p2987_p6 }
0x1487   : > { %2841 = dma.done.wait (!%p2673_p8), %s2183_s3, 128  }
0x1488   : > { %2843 = vsyncadd (!%p2673_p8), %s2183_s3, 4294967168  ;;  %s2192_s21 = scalar_lea.sflag [#allocation6], %s2182_s2 }
0x1489   : > { %2845 = dma.done.wait (!%p2673_p8), %s2192_s21, 512  }
0x148a   : > { %2847 = vsyncadd (!%p2673_p8), %s2192_s21, 4294966784  ;;  %p28_p5 = scmp.ge.s32.totalorder %s2970_s19, 4   ;;  %s3458_s29 = smov %s2854_s30 }
0x148b   : > { %s3459_s30 = smov %s2858_s15  ;;  %s3460_s15 = smov %s2981_s22 }
0x148c   : > { %s3461_s16 = smov %s2970_s19  ;;  %30 = sbr.rel (!%p28_p5) target bundleno = 13 (0xd), region = 152 }
0x1493   :  { %2197 = vsyncpa [#allocation4], 1 }
0x1494   :  { %2199 = vsyncpa [#allocation4 + $0x1], 1 }
0x1495   :  { %2200 = vsyncpa [#allocation6], 1 }
0x1496   :  { %2202 = vsyncpa [#allocation6 + $0x1], 1 }

</bundles_post_ra>
